<compile_context>
chip_gen: v7x
topology: tpu7x:2x2x1
jax: 0.10.0
libtpu: 0.0.40
codegen_flags: <defaults>
</compile_context>

<pallas_src>
import functools

import jax
import jax.numpy as jnp
from jax.experimental import pallas as pl
from jax.experimental.pallas import tpu as pltpu

F32 = jnp.float32

IN_FEATURES = 36                          # in_features
MLP_RATIO = 36.0
HIDDEN = int(IN_FEATURES * MLP_RATIO)     # 1296
OUT_FEATURES = 2

TB_MAX = 256                              # rows per grid step (feedback: 256-512)


def _round_up(n, m):
    return ((n + m - 1) // m) * m


# --------------------------------------------------------------------------- exact GELU (erf via A&S 7.1.26)
def _erf(x):
    a1, a2, a3, a4, a5 = 0.254829592, -0.284496736, 1.421413741, -1.453152027, 1.061405429
    p = 0.3275911
    sign = jnp.where(x >= 0.0, 1.0, -1.0)
    ax = jnp.abs(x)
    # rational-term divide routed to the EUP (approx reciprocal, co-issued slot)
    t = pl.reciprocal(1.0 + p * ax, approx=True)
    poly = ((((a5 * t + a4) * t + a3) * t + a2) * t + a1) * t
    return sign * (1.0 - poly * jnp.exp(-ax * ax))


def _gelu(x):
    return 0.5 * x * (1.0 + _erf(x * 0.7071067811865475))


# --------------------------------------------------------------------------- fused Mlp kernel (one batch tile per grid step)
def _mlp_kernel(x_ref, w1_ref, b1_ref, w2_ref, b2_ref, w3_ref, b3_ref, o_ref):
    x = x_ref[...]                                                          # (TB, D)

    # fc1 + (drop=id) + gelu
    h = jnp.dot(x, w1_ref[...], preferred_element_type=F32) + b1_ref[...]  # (TB, H)
    h = _gelu(h)

    # fc2 + (drop=id) + gelu
    h = jnp.dot(h, w2_ref[...], preferred_element_type=F32) + b2_ref[...]  # (TB, D)
    h = _gelu(h)

    # fc3 + (drop=id) + gelu  (GELU on logits before softmax, per the spec)
    z = jnp.dot(h, w3_ref[...], preferred_element_type=F32) + b3_ref[...]  # (TB, 2)
    z = _gelu(z)

    # softmax over last dim (width 2) -- exact reciprocal; tensor is tiny.
    z = z - jnp.max(z, axis=-1, keepdims=True)
    e = jnp.exp(z)
    o_ref[...] = e / jnp.sum(e, axis=-1, keepdims=True)


@functools.lru_cache(maxsize=None)
def _build_mlp(b_pad, tb, d_in, hidden, d_out):
    const2 = lambda i: (0, 0)        # weights / biases: resident across grid steps
    return pl.pallas_call(
        _mlp_kernel,
        grid=(b_pad // tb,),
        in_specs=[
            pl.BlockSpec((tb, d_in), lambda i: (i, 0)),     # x tile
            pl.BlockSpec((d_in, hidden), const2),           # w1
            pl.BlockSpec((1, hidden), const2),               # b1
            pl.BlockSpec((hidden, d_in), const2),            # w2
            pl.BlockSpec((1, d_in), const2),                 # b2
            pl.BlockSpec((d_in, d_out), const2),             # w3
            pl.BlockSpec((1, d_out), const2),                # b3
        ],
        out_specs=pl.BlockSpec((tb, d_out), lambda i: (i, 0)),
        out_shape=jax.ShapeDtypeStruct((b_pad, d_out), F32),
        compiler_params=pltpu.CompilerParams(
            dimension_semantics=("parallel",)),              # v7x: 2 TCs split batch
    )


def mlp_forward(x, params):
    """x: (B, in_features) float32 -> (B, 2) float32 softmax probabilities."""
    B, D = x.shape
    hidden = params["w1"].shape[1]
    d_out = params["w3"].shape[1]

    tb = min(TB_MAX, _round_up(max(B, 1), 8))     # small B -> small (8-aligned) tile
    b_pad = _round_up(B, tb)
    xp = jnp.pad(x, ((0, b_pad - B), (0, 0))) if b_pad != B else x

    out = _build_mlp(b_pad, tb, D, hidden, d_out)(
        xp,
        params["w1"], params["b1"],
        params["w2"], params["b2"],
        params["w3"], params["b3"],
    )
    return out[:B] if b_pad != B else out


# --------------------------------------------------------------------------- pure-JAX reference
def mlp_reference(x, params):
    h = x @ params["w1"] + params["b1"]
    h = jax.nn.gelu(h, approximate=False)
    h = h @ params["w2"] + params["b2"]
    h = jax.nn.gelu(h, approximate=False)
    z = h @ params["w3"] + params["b3"]
    z = jax.nn.gelu(z, approximate=False)
    return jax.nn.softmax(z, axis=-1)


# --------------------------------------------------------------------------- deterministic params (torch nn.Linear default init)
def init_params(key):
    keys = iter(jax.random.split(key, 8))

    def dense(fan_in, fan_out):
        s = 1.0 / jnp.sqrt(jnp.asarray(fan_in, F32))
        w = jax.random.uniform(next(keys), (fan_in, fan_out), F32, -s, s)
        b = jax.random.uniform(next(keys), (1, fan_out), F32, -s, s)
        return w, b

    p = {}
    p["w1"], p["b1"] = dense(IN_FEATURES, HIDDEN)
    p["w2"], p["b2"] = dense(HIDDEN, IN_FEATURES)
    p["w3"], p["b3"] = dense(IN_FEATURES, OUT_FEATURES)
    return p


# --------------------------------------------------------------------------- main
if __name__ == "__main__":
    root = jax.random.PRNGKey(0)
    pkey, xkey, xkey2 = jax.random.split(root, 3)
    params = init_params(pkey)

    # small-batch test (single grid step, TB=8)
    batch = 2
    x = jax.random.normal(xkey, (batch, IN_FEATURES), F32)
    out = jax.block_until_ready(mlp_forward(x, params))
    assert out.shape == (batch, OUT_FEATURES)
    assert bool(jnp.all(jnp.isfinite(out)))
    ref = mlp_reference(x, params)
    assert bool(jnp.allclose(out, ref, atol=1e-2)), (out, ref)
    assert bool(jnp.allclose(jnp.sum(out, axis=-1), 1.0, atol=1e-3))

    # larger-batch test exercising the tiled grid (grid = 3, padded last tile)
    batch2 = 600
    x2 = jax.random.normal(xkey2, (batch2, IN_FEATURES), F32)
    out2 = jax.block_until_ready(mlp_forward(x2, params))
    assert out2.shape == (batch2, OUT_FEATURES)
    assert bool(jnp.all(jnp.isfinite(out2)))
    ref2 = mlp_reference(x2, params)
    assert bool(jnp.allclose(out2, ref2, atol=1e-2)), float(jnp.max(jnp.abs(out2 - ref2)))
    assert bool(jnp.allclose(jnp.sum(out2, axis=-1), 1.0, atol=1e-3))

    print("KERNEL_OK")
</pallas_src>

<mosaic_0001>
module attributes {stable_mosaic.version = 11 : i64} {
  func.func @_mlp_kernel(%arg0: i32, %arg1: memref<8x36xf32, #tpu.memory_space<vmem>>, %arg2: memref<36x1296xf32, #tpu.memory_space<vmem>>, %arg3: memref<1x1296xf32, #tpu.memory_space<vmem>>, %arg4: memref<1296x36xf32, #tpu.memory_space<vmem>>, %arg5: memref<1x36xf32, #tpu.memory_space<vmem>>, %arg6: memref<36x2xf32, #tpu.memory_space<vmem>>, %arg7: memref<1x2xf32, #tpu.memory_space<vmem>>, %arg8: memref<8x2xf32, #tpu.memory_space<vmem>>) attributes {dimension_semantics = [#tpu.dimension_semantics<parallel>], iteration_bounds = array<i64: 1>, scalar_prefetch = 0 : i64, scratch_operands = 0 : i64, tpu.core_type = #tpu.core_type<tc>, window_params = [{transform_indices = @transform_0, window_bounds = array<i64: 8, 36>}, {pipeline_mode = #tpu.pipeline_mode<synchronous>, transform_indices = @transform_1, window_bounds = array<i64: 36, 1296>}, {pipeline_mode = #tpu.pipeline_mode<synchronous>, transform_indices = @transform_2, window_bounds = array<i64: 1, 1296>}, {pipeline_mode = #tpu.pipeline_mode<synchronous>, transform_indices = @transform_3, window_bounds = array<i64: 1296, 36>}, {pipeline_mode = #tpu.pipeline_mode<synchronous>, transform_indices = @transform_4, window_bounds = array<i64: 1, 36>}, {pipeline_mode = #tpu.pipeline_mode<synchronous>, transform_indices = @transform_5, window_bounds = array<i64: 36, 2>}, {pipeline_mode = #tpu.pipeline_mode<synchronous>, transform_indices = @transform_6, window_bounds = array<i64: 1, 2>}, {transform_indices = @transform_7, window_bounds = array<i64: 8, 2>}]} {
    %c0 = arith.constant 0 : index
    %c0_0 = arith.constant 0 : index
    %0 = vector.load %arg1[%c0, %c0_0] : memref<8x36xf32, #tpu.memory_space<vmem>>, vector<8x36xf32>
    %c0_1 = arith.constant 0 : index
    %c0_2 = arith.constant 0 : index
    %1 = vector.load %arg2[%c0_1, %c0_2] : memref<36x1296xf32, #tpu.memory_space<vmem>>, vector<36x1296xf32>
    %cst = arith.constant dense<0.000000e+00> : vector<8x1296xf32>
    %2 = tpu.matmul %0, %1, %cst {dimension_numbers = #tpu.dot_dimension_numbers<[1], [0], [0], [1], [0, 0, 1, 1], [], []>} : vector<8x36xf32>, vector<36x1296xf32>, vector<8x1296xf32> -> vector<8x1296xf32>
    %c0_3 = arith.constant 0 : index
    %c0_4 = arith.constant 0 : index
    %3 = vector.load %arg3[%c0_3, %c0_4] : memref<1x1296xf32, #tpu.memory_space<vmem>>, vector<1x1296xf32>
    %4 = vector.broadcast %3 : vector<1x1296xf32> to vector<8x1296xf32>
    %5 = arith.addf %2, %4 : vector<8x1296xf32>
    %cst_5 = arith.constant 5.000000e-01 : f32
    %6 = vector.broadcast %cst_5 : f32 to vector<8x1296xf32>
    %7 = arith.mulf %6, %5 : vector<8x1296xf32>
    %cst_6 = arith.constant 0.707106769 : f32
    %8 = vector.broadcast %cst_6 : f32 to vector<8x1296xf32>
    %9 = arith.mulf %5, %8 : vector<8x1296xf32>
    %cst_7 = arith.constant 0.000000e+00 : f32
    %10 = vector.broadcast %cst_7 : f32 to vector<8x1296xf32>
    %11 = arith.cmpf oge, %9, %10 : vector<8x1296xf32>
    %cst_8 = arith.constant 1.000000e+00 : f32
    %cst_9 = arith.constant -1.000000e+00 : f32
    %12 = vector.broadcast %cst_8 : f32 to vector<8x1296xf32>
    %13 = vector.broadcast %cst_9 : f32 to vector<8x1296xf32>
    %14 = arith.select %11, %12, %13 : vector<8x1296xi1>, vector<8x1296xf32>
    %15 = math.absf %9 : vector<8x1296xf32>
    %cst_10 = arith.constant 0.327591091 : f32
    %16 = vector.broadcast %cst_10 : f32 to vector<8x1296xf32>
    %17 = arith.mulf %16, %15 : vector<8x1296xf32>
    %cst_11 = arith.constant 1.000000e+00 : f32
    %18 = vector.broadcast %cst_11 : f32 to vector<8x1296xf32>
    %19 = arith.addf %18, %17 : vector<8x1296xf32>
    %20 = tpu.reciprocal %19 {approx = true} : vector<8x1296xf32> -> vector<8x1296xf32>
    %cst_12 = arith.constant 1.06140542 : f32
    %21 = vector.broadcast %cst_12 : f32 to vector<8x1296xf32>
    %22 = arith.mulf %21, %20 : vector<8x1296xf32>
    %cst_13 = arith.constant -1.45315206 : f32
    %23 = vector.broadcast %cst_13 : f32 to vector<8x1296xf32>
    %24 = arith.addf %22, %23 : vector<8x1296xf32>
    %25 = arith.mulf %24, %20 : vector<8x1296xf32>
    %cst_14 = arith.constant 1.42141378 : f32
    %26 = vector.broadcast %cst_14 : f32 to vector<8x1296xf32>
    %27 = arith.addf %25, %26 : vector<8x1296xf32>
    %28 = arith.mulf %27, %20 : vector<8x1296xf32>
    %cst_15 = arith.constant -0.284496725 : f32
    %29 = vector.broadcast %cst_15 : f32 to vector<8x1296xf32>
    %30 = arith.addf %28, %29 : vector<8x1296xf32>
    %31 = arith.mulf %30, %20 : vector<8x1296xf32>
    %cst_16 = arith.constant 0.254829586 : f32
    %32 = vector.broadcast %cst_16 : f32 to vector<8x1296xf32>
    %33 = arith.addf %31, %32 : vector<8x1296xf32>
    %34 = arith.mulf %33, %20 : vector<8x1296xf32>
    %cst_17 = arith.constant 0.000000e+00 : f32
    %35 = vector.broadcast %cst_17 : f32 to vector<8x1296xf32>
    %36 = arith.subf %35, %15 : vector<8x1296xf32>
    %37 = arith.mulf %36, %15 : vector<8x1296xf32>
    %38 = math.exp %37 : vector<8x1296xf32>
    %39 = arith.mulf %34, %38 : vector<8x1296xf32>
    %cst_18 = arith.constant 1.000000e+00 : f32
    %40 = vector.broadcast %cst_18 : f32 to vector<8x1296xf32>
    %41 = arith.subf %40, %39 : vector<8x1296xf32>
    %42 = arith.mulf %14, %41 : vector<8x1296xf32>
    %cst_19 = arith.constant 1.000000e+00 : f32
    %43 = vector.broadcast %cst_19 : f32 to vector<8x1296xf32>
    %44 = arith.addf %43, %42 : vector<8x1296xf32>
    %45 = arith.mulf %7, %44 : vector<8x1296xf32>
    %c0_20 = arith.constant 0 : index
    %c0_21 = arith.constant 0 : index
    %46 = vector.load %arg4[%c0_20, %c0_21] : memref<1296x36xf32, #tpu.memory_space<vmem>>, vector<1296x36xf32>
    %cst_22 = arith.constant dense<0.000000e+00> : vector<8x36xf32>
    %47 = tpu.matmul %45, %46, %cst_22 {dimension_numbers = #tpu.dot_dimension_numbers<[1], [0], [0], [1], [0, 0, 1, 1], [], []>} : vector<8x1296xf32>, vector<1296x36xf32>, vector<8x36xf32> -> vector<8x36xf32>
    %c0_23 = arith.constant 0 : index
    %c0_24 = arith.constant 0 : index
    %48 = vector.load %arg5[%c0_23, %c0_24] : memref<1x36xf32, #tpu.memory_space<vmem>>, vector<1x36xf32>
    %49 = vector.broadcast %48 : vector<1x36xf32> to vector<8x36xf32>
    %50 = arith.addf %47, %49 : vector<8x36xf32>
    %cst_25 = arith.constant 5.000000e-01 : f32
    %51 = vector.broadcast %cst_25 : f32 to vector<8x36xf32>
    %52 = arith.mulf %51, %50 : vector<8x36xf32>
    %cst_26 = arith.constant 0.707106769 : f32
    %53 = vector.broadcast %cst_26 : f32 to vector<8x36xf32>
    %54 = arith.mulf %50, %53 : vector<8x36xf32>
    %cst_27 = arith.constant 0.000000e+00 : f32
    %55 = vector.broadcast %cst_27 : f32 to vector<8x36xf32>
    %56 = arith.cmpf oge, %54, %55 : vector<8x36xf32>
    %cst_28 = arith.constant 1.000000e+00 : f32
    %cst_29 = arith.constant -1.000000e+00 : f32
    %57 = vector.broadcast %cst_28 : f32 to vector<8x36xf32>
    %58 = vector.broadcast %cst_29 : f32 to vector<8x36xf32>
    %59 = arith.select %56, %57, %58 : vector<8x36xi1>, vector<8x36xf32>
    %60 = math.absf %54 : vector<8x36xf32>
    %cst_30 = arith.constant 0.327591091 : f32
    %61 = vector.broadcast %cst_30 : f32 to vector<8x36xf32>
    %62 = arith.mulf %61, %60 : vector<8x36xf32>
    %cst_31 = arith.constant 1.000000e+00 : f32
    %63 = vector.broadcast %cst_31 : f32 to vector<8x36xf32>
    %64 = arith.addf %63, %62 : vector<8x36xf32>
    %65 = tpu.reciprocal %64 {approx = true} : vector<8x36xf32> -> vector<8x36xf32>
    %cst_32 = arith.constant 1.06140542 : f32
    %66 = vector.broadcast %cst_32 : f32 to vector<8x36xf32>
    %67 = arith.mulf %66, %65 : vector<8x36xf32>
    %cst_33 = arith.constant -1.45315206 : f32
    %68 = vector.broadcast %cst_33 : f32 to vector<8x36xf32>
    %69 = arith.addf %67, %68 : vector<8x36xf32>
    %70 = arith.mulf %69, %65 : vector<8x36xf32>
    %cst_34 = arith.constant 1.42141378 : f32
    %71 = vector.broadcast %cst_34 : f32 to vector<8x36xf32>
    %72 = arith.addf %70, %71 : vector<8x36xf32>
    %73 = arith.mulf %72, %65 : vector<8x36xf32>
    %cst_35 = arith.constant -0.284496725 : f32
    %74 = vector.broadcast %cst_35 : f32 to vector<8x36xf32>
    %75 = arith.addf %73, %74 : vector<8x36xf32>
    %76 = arith.mulf %75, %65 : vector<8x36xf32>
    %cst_36 = arith.constant 0.254829586 : f32
    %77 = vector.broadcast %cst_36 : f32 to vector<8x36xf32>
    %78 = arith.addf %76, %77 : vector<8x36xf32>
    %79 = arith.mulf %78, %65 : vector<8x36xf32>
    %cst_37 = arith.constant 0.000000e+00 : f32
    %80 = vector.broadcast %cst_37 : f32 to vector<8x36xf32>
    %81 = arith.subf %80, %60 : vector<8x36xf32>
    %82 = arith.mulf %81, %60 : vector<8x36xf32>
    %83 = math.exp %82 : vector<8x36xf32>
    %84 = arith.mulf %79, %83 : vector<8x36xf32>
    %cst_38 = arith.constant 1.000000e+00 : f32
    %85 = vector.broadcast %cst_38 : f32 to vector<8x36xf32>
    %86 = arith.subf %85, %84 : vector<8x36xf32>
    %87 = arith.mulf %59, %86 : vector<8x36xf32>
    %cst_39 = arith.constant 1.000000e+00 : f32
    %88 = vector.broadcast %cst_39 : f32 to vector<8x36xf32>
    %89 = arith.addf %88, %87 : vector<8x36xf32>
    %90 = arith.mulf %52, %89 : vector<8x36xf32>
    %c0_40 = arith.constant 0 : index
    %c0_41 = arith.constant 0 : index
    %91 = vector.load %arg6[%c0_40, %c0_41] : memref<36x2xf32, #tpu.memory_space<vmem>>, vector<36x2xf32>
    %cst_42 = arith.constant dense<0.000000e+00> : vector<8x2xf32>
    %92 = tpu.matmul %90, %91, %cst_42 {dimension_numbers = #tpu.dot_dimension_numbers<[1], [0], [0], [1], [0, 0, 1, 1], [], []>} : vector<8x36xf32>, vector<36x2xf32>, vector<8x2xf32> -> vector<8x2xf32>
    %c0_43 = arith.constant 0 : index
    %c0_44 = arith.constant 0 : index
    %93 = vector.load %arg7[%c0_43, %c0_44] : memref<1x2xf32, #tpu.memory_space<vmem>>, vector<1x2xf32>
    %94 = vector.broadcast %93 : vector<1x2xf32> to vector<8x2xf32>
    %95 = arith.addf %92, %94 : vector<8x2xf32>
    %cst_45 = arith.constant 5.000000e-01 : f32
    %96 = vector.broadcast %cst_45 : f32 to vector<8x2xf32>
    %97 = arith.mulf %96, %95 : vector<8x2xf32>
    %cst_46 = arith.constant 0.707106769 : f32
    %98 = vector.broadcast %cst_46 : f32 to vector<8x2xf32>
    %99 = arith.mulf %95, %98 : vector<8x2xf32>
    %cst_47 = arith.constant 0.000000e+00 : f32
    %100 = vector.broadcast %cst_47 : f32 to vector<8x2xf32>
    %101 = arith.cmpf oge, %99, %100 : vector<8x2xf32>
    %cst_48 = arith.constant 1.000000e+00 : f32
    %cst_49 = arith.constant -1.000000e+00 : f32
    %102 = vector.broadcast %cst_48 : f32 to vector<8x2xf32>
    %103 = vector.broadcast %cst_49 : f32 to vector<8x2xf32>
    %104 = arith.select %101, %102, %103 : vector<8x2xi1>, vector<8x2xf32>
    %105 = math.absf %99 : vector<8x2xf32>
    %cst_50 = arith.constant 0.327591091 : f32
    %106 = vector.broadcast %cst_50 : f32 to vector<8x2xf32>
    %107 = arith.mulf %106, %105 : vector<8x2xf32>
    %cst_51 = arith.constant 1.000000e+00 : f32
    %108 = vector.broadcast %cst_51 : f32 to vector<8x2xf32>
    %109 = arith.addf %108, %107 : vector<8x2xf32>
    %110 = tpu.reciprocal %109 {approx = true} : vector<8x2xf32> -> vector<8x2xf32>
    %cst_52 = arith.constant 1.06140542 : f32
    %111 = vector.broadcast %cst_52 : f32 to vector<8x2xf32>
    %112 = arith.mulf %111, %110 : vector<8x2xf32>
    %cst_53 = arith.constant -1.45315206 : f32
    %113 = vector.broadcast %cst_53 : f32 to vector<8x2xf32>
    %114 = arith.addf %112, %113 : vector<8x2xf32>
    %115 = arith.mulf %114, %110 : vector<8x2xf32>
    %cst_54 = arith.constant 1.42141378 : f32
    %116 = vector.broadcast %cst_54 : f32 to vector<8x2xf32>
    %117 = arith.addf %115, %116 : vector<8x2xf32>
    %118 = arith.mulf %117, %110 : vector<8x2xf32>
    %cst_55 = arith.constant -0.284496725 : f32
    %119 = vector.broadcast %cst_55 : f32 to vector<8x2xf32>
    %120 = arith.addf %118, %119 : vector<8x2xf32>
    %121 = arith.mulf %120, %110 : vector<8x2xf32>
    %cst_56 = arith.constant 0.254829586 : f32
    %122 = vector.broadcast %cst_56 : f32 to vector<8x2xf32>
    %123 = arith.addf %121, %122 : vector<8x2xf32>
    %124 = arith.mulf %123, %110 : vector<8x2xf32>
    %cst_57 = arith.constant 0.000000e+00 : f32
    %125 = vector.broadcast %cst_57 : f32 to vector<8x2xf32>
    %126 = arith.subf %125, %105 : vector<8x2xf32>
    %127 = arith.mulf %126, %105 : vector<8x2xf32>
    %128 = math.exp %127 : vector<8x2xf32>
    %129 = arith.mulf %124, %128 : vector<8x2xf32>
    %cst_58 = arith.constant 1.000000e+00 : f32
    %130 = vector.broadcast %cst_58 : f32 to vector<8x2xf32>
    %131 = arith.subf %130, %129 : vector<8x2xf32>
    %132 = arith.mulf %104, %131 : vector<8x2xf32>
    %cst_59 = arith.constant 1.000000e+00 : f32
    %133 = vector.broadcast %cst_59 : f32 to vector<8x2xf32>
    %134 = arith.addf %133, %132 : vector<8x2xf32>
    %135 = arith.mulf %97, %134 : vector<8x2xf32>
    %cst_60 = arith.constant dense<0xFF800000> : vector<8xf32>
    %136 = vector.multi_reduction <maximumf>, %135, %cst_60 [1] : vector<8x2xf32> to vector<8xf32>
    %137 = vector.shape_cast %136 : vector<8xf32> to vector<8x1xf32>
    %138 = vector.broadcast %137 : vector<8x1xf32> to vector<8x2xf32>
    %139 = arith.subf %135, %138 : vector<8x2xf32>
    %140 = math.exp %139 : vector<8x2xf32>
    %cst_61 = arith.constant dense<0.000000e+00> : vector<8xf32>
    %141 = vector.multi_reduction <add>, %140, %cst_61 [1] : vector<8x2xf32> to vector<8xf32>
    %142 = vector.shape_cast %141 : vector<8xf32> to vector<8x1xf32>
    %143 = vector.broadcast %142 : vector<8x1xf32> to vector<8x2xf32>
    %144 = arith.divf %140, %143 : vector<8x2xf32>
    %c0_62 = arith.constant 0 : index
    %c0_63 = arith.constant 0 : index
    %145 = vector.load %arg8[%c0_62, %c0_63] : memref<8x2xf32, #tpu.memory_space<vmem>>, vector<8x2xf32>
    tpu.vector_store %arg8[%c0_62, %c0_63], %144 {strides = array<i32>} : memref<8x2xf32, #tpu.memory_space<vmem>>, vector<8x2xf32>,
    return
  }
  func.func @transform_0(%arg0: i32) -> (i32, i32) {
    %c0_i32 = arith.constant 0 : i32
    %c0_i32_0 = arith.constant 0 : i32
    return %arg0, %c0_i32 : i32, i32
  }
  func.func @transform_1(%arg0: i32) -> (i32, i32) {
    %c0_i32 = arith.constant 0 : i32
    %c0_i32_0 = arith.constant 0 : i32
    %c0_i32_1 = arith.constant 0 : i32
    return %c0_i32, %c0_i32_0 : i32, i32
  }
  func.func @transform_2(%arg0: i32) -> (i32, i32) {
    %c0_i32 = arith.constant 0 : i32
    %c0_i32_0 = arith.constant 0 : i32
    %c0_i32_1 = arith.constant 0 : i32
    return %c0_i32, %c0_i32_0 : i32, i32
  }
  func.func @transform_3(%arg0: i32) -> (i32, i32) {
    %c0_i32 = arith.constant 0 : i32
    %c0_i32_0 = arith.constant 0 : i32
    %c0_i32_1 = arith.constant 0 : i32
    return %c0_i32, %c0_i32_0 : i32, i32
  }
  func.func @transform_4(%arg0: i32) -> (i32, i32) {
    %c0_i32 = arith.constant 0 : i32
    %c0_i32_0 = arith.constant 0 : i32
    %c0_i32_1 = arith.constant 0 : i32
    return %c0_i32, %c0_i32_0 : i32, i32
  }
  func.func @transform_5(%arg0: i32) -> (i32, i32) {
    %c0_i32 = arith.constant 0 : i32
    %c0_i32_0 = arith.constant 0 : i32
    %c0_i32_1 = arith.constant 0 : i32
    return %c0_i32, %c0_i32_0 : i32, i32
  }
  func.func @transform_6(%arg0: i32) -> (i32, i32) {
    %c0_i32 = arith.constant 0 : i32
    %c0_i32_0 = arith.constant 0 : i32
    %c0_i32_1 = arith.constant 0 : i32
    return %c0_i32, %c0_i32_0 : i32, i32
  }
  func.func @transform_7(%arg0: i32) -> (i32, i32) {
    %c0_i32 = arith.constant 0 : i32
    %c0_i32_0 = arith.constant 0 : i32
    return %arg0, %c0_i32 : i32, i32
  }
}

</mosaic_0001>

<bundles_post_ra>
// kernel: tpu_custom_call.1
= control target key start
LH: loop header
LB: loop body
LE: loop exit
PB: predicated region body
PF: predicated region fallthrough
CT: control target
= control target key end

     0   :  { %v3296_v3 = vmov 0.0   ;;  %vm145_vm0 = vcmask 1043456   ;;  %vm141_vm1 = vcmask 293888   ;;  %vm2162_vm2 = vmmov 0   ;;  %s3288_s1 = inlined_call_operand.vmem [shape: f32[36,1296], index: 1, kind: input, shape index: {}]   ;;  %s3289_s0 = inlined_call_operand.vmem [shape: f32[8,36], index: 0, kind: input, shape index: {}]   ;;  %s3290_s3 = inlined_call_operand.vmem [shape: f32[1296,36], index: 3, kind: input, shape index: {}]   ;;  %s3291_s2 = inlined_call_operand.vmem [shape: f32[1,1296], index: 2, kind: input, shape index: {}]   ;;  %s3292_s5 = inlined_call_operand.vmem [shape: f32[36,2], index: 5, kind: input, shape index: {}]   ;;  %s3293_s4 = inlined_call_operand.vmem [shape: f32[1,36], index: 4, kind: input, shape index: {}]   ;;  %s3294_s6 = inlined_call_operand.vmem [shape: f32[1,2], index: 6, kind: input, shape index: {}]   ;;  %s3295_s7 = inlined_call_operand.vmem [shape: f32[8,2], index: 7, kind: output, shape index: {}]  }
   0x1   :  { %v28_v0 = vld [vmem:[%s3288_s1 + $0x8] sm:$0xff]  ;;  %v39_v1 = vld [vmem:[%s3288_s1 + $0x60] sm:$0xff]  ;;  %243 = vmatprep.mubr.f32.mxu1 %v3296_v3  ;;  %385 = vmatprep.mubr.f32.mxu0 %v3296_v3  ;;  %v38_v7 = vld [vmem:[%s3288_s1 + $0x58] sm:$0xff]  ;;  %vm1059_vm13 = vcmask 130048  }
   0x2   :  { %v32_v2 = vld [vmem:[%s3288_s1 + $0x28] sm:$0xff]  ;;  %v1885_v4 = vpack.c.bf16 %v39_v1, %v28_v0  ;;  %v43_v5 = vld [vmem:[%s3288_s1 + $0x80] sm:$0xff]  ;;  %v42_v11 = vld [vmem:[%s3288_s1 + $0x78] sm:$0xff] }
   0x3   :  { %v27_v6 = vld [vmem:[%s3288_s1] sm:$0xff]  ;;  %v1901_v8 = vpack.c.bf16 %v43_v5, %v32_v2  ;;  %v50_v12 = vld [vmem:[%s3288_s1 + $0xb8] sm:$0xff]  ;;  %v61_v14 = vld [vmem:[%s3288_s1 + $0x110] sm:$0xff] }
   0x4   :  { %v1887_v9 = vpack.c.bf16 %v38_v7, %v27_v6  ;;  %v31_v10 = vld [vmem:[%s3288_s1 + $0x20] sm:$0xff]  ;;  %1886 = vmatprep.subr.bf16.mxu1 %v1885_v4  ;;  %v54_v15 = vld [vmem:[%s3288_s1 + $0xd8] sm:$0xff]  ;;  %v65_v16 = vld [vmem:[%s3288_s1 + $0x130] sm:$0xff]  ;;  %v1889_v17 = vpack.c.bf16 %v61_v14, %v50_v12  ;;  %v3298_v14 = vmov 0.0|0.0  }
   0x5   :  { %v1903_v13 = vpack.c.bf16 %v42_v11, %v31_v10  ;;  %1902 = vmatprep.subr.bf16.mxu0 %v1901_v8  ;;  %v1905_v18 = vpack.c.bf16 %v65_v16, %v54_v15  ;;  %v49_v19 = vld [vmem:[%s3288_s1 + $0xb0] sm:$0xff]  ;;  %v60_v20 = vld [vmem:[%s3288_s1 + $0x108] sm:$0xff]  ;;  %v30_v27 = vld [vmem:[%s3288_s1 + $0x18] sm:$0xff] }
   0x6   :  { %1888 = vmatpush1.bf16.msra.mxu1 %v1887_v9  ;;  %v53_v21 = vld [vmem:[%s3288_s1 + $0xd0] sm:$0xff]  ;;  %v1891_v22 = vpack.c.bf16 %v60_v20, %v49_v19  ;;  %v64_v23 = vld [vmem:[%s3288_s1 + $0x128] sm:$0xff]  ;;  %v71_v29 = vld [vmem:[%s3288_s1 + $0x160] sm:$0xf] }
   0x7   :  { %1904 = vmatpush1.bf16.msra.mxu0 %v1903_v13  ;;  %1890 = vmatprep.subr.bf16.mxu1 %v1889_v17  ;;  %v1907_v24 = vpack.c.bf16 %v64_v23, %v53_v21  ;;  %v72_v25 = vld [vmem:[%s3288_s1 + $0x168] sm:$0xf]  ;;  %v41_v28 = vld [vmem:[%s3288_s1 + $0x70] sm:$0xff]  ;;  %v75_v32 = vld [vmem:[%s3288_s1 + $0x180] sm:$0xf] }
   0x8   :  { %1906 = vmatprep.subr.bf16.mxu0 %v1905_v18  ;;  %v76_v26 = vld [vmem:[%s3288_s1 + $0x188] sm:$0xf]  ;;  %v29_v30 = vld [vmem:[%s3288_s1 + $0x10] sm:$0xff]  ;;  %v63_v34 = vld [vmem:[%s3288_s1 + $0x120] sm:$0xff]  ;;  %v1893_v36 = vpack.c.bf16 %v41_v28, %v30_v27 }
   0x9   :  { %v40_v31 = vld [vmem:[%s3288_s1 + $0x68] sm:$0xff]  ;;  %v2289_v35 = vld [vmem:[%s3289_s0] sm:$0xff]  ;;  %v62_v43 = vld [vmem:[%s3288_s1 + $0x118] sm:$0xff] }
   0xa   :  { %1892 = vmatpush1.bf16.msra.mxu1 %v1891_v22  ;;  %v52_v33 = vld [vmem:[%s3288_s1 + $0xc8] sm:$0xff]  ;;  %v47_v38 = vld [vmem:[%s3288_s1 + $0xa0] sm:$0xff]  ;;  %v1895_v39 = vpack.c.bf16 %v40_v31, %v29_v30  ;;  %v46_v45 = vld [vmem:[%s3288_s1 + $0x98] sm:$0xff] }
   0xb   :  { %1908 = vmatpush1.bf16.msra.mxu0 %v1907_v24  ;;  %1640 = vmatprep.subr.msk.mxu1 %vm145_vm0, %v72_v25  ;;  %v36_v37 = vld [vmem:[%s3288_s1 + $0x48] sm:$0xff]  ;;  %v35_v40 = vld [vmem:[%s3288_s1 + $0x40] sm:$0xff]  ;;  %v1897_v41 = vpack.c.bf16 %v63_v34, %v52_v33  ;;  %v58_v47 = vld [vmem:[%s3288_s1 + $0xf8] sm:$0xff] }
   0xc   :  { %1646 = vmatprep.subr.msk.mxu0 %vm145_vm0, %v76_v26  ;;  %v51_v42 = vld [vmem:[%s3288_s1 + $0xc0] sm:$0xff]  ;;  %v1917_v44 = vpack.c.bf16 %v47_v38, %v36_v37  ;;  %v1919_v46 = vpack.c.bf16 %v46_v45, %v35_v40  ;;  %v69_v48 = vld [vmem:[%s3288_s1 + $0x150] sm:$0xff]  ;;  %v68_v51 = vld [vmem:[%s3288_s1 + $0x148] sm:$0xff] }
   0xd   :  { %v1921_v49 = vpack.c.bf16 %v69_v48, %v58_v47  ;;  %v57_v50 = vld [vmem:[%s3288_s1 + $0xf0] sm:$0xff]  ;;  %v1899_v52 = vpack.c.bf16 %v62_v43, %v51_v42  ;;  %v74_v53 = vld [vmem:[%s3288_s1 + $0x178] sm:$0xf]  ;;  %v44_v58 = vld [vmem:[%s3288_s1 + $0x88] sm:$0xff] }
   0xe   :  { %1641 = vmatpush1.msk.msra.mxu1 %vm145_vm0, %v71_v29  ;;  %v34_v54 = vld [vmem:[%s3288_s1 + $0x38] sm:$0xff]  ;;  %v45_v55 = vld [vmem:[%s3288_s1 + $0x90] sm:$0xff]  ;;  %v1923_v56 = vpack.c.bf16 %v68_v51, %v57_v50  ;;  %v56_v59 = vld [vmem:[%s3288_s1 + $0xe8] sm:$0xff] }
   0xf   :  { %1647 = vmatpush1.msk.msra.mxu0 %vm145_vm0, %v75_v32  ;;  %1642 = vmatmul.mubr.msk.f32.vlgmr.msra.gmra.mrb[0].mxu1 %vm141_vm1, %v2289_v35  ;;  %v33_v57 = vld [vmem:[%s3288_s1 + $0x30] sm:$0xff]  ;;  %v67_v60 = vld [vmem:[%s3288_s1 + $0x140] sm:$0xff]  ;;  %v80_v61 = vld [vmem:[%s3288_s1 + $0x1a8] sm:$0xf]  ;;  %v1909_v63 = vpack.c.bf16 %v45_v55, %v34_v54 }
  0x10   :  { %1894 = vmatprep.subr.bf16.mxu1 %v1893_v36  ;;  %1648 = vmatmul.mubr.msk.f32.vlgmr.msra.gmra.mrb[0].mxu0 %vm141_vm1, %v2289_v35  ;;  %v73_v62 = vld [vmem:[%s3288_s1 + $0x170] sm:$0xf]  ;;  %v1911_v0 = vpack.c.bf16 %v44_v58, %v33_v57  ;;  %v1913_v1 = vpack.c.bf16 %v67_v60, %v56_v59  ;;  %v55_v2 = vld [vmem:[%s3288_s1 + $0xe0] sm:$0xff]  ;;  %v66_v4 = vld [vmem:[%s3288_s1 + $0x138] sm:$0xff] }
  0x11   :  { %1896 = vmatpush1.bf16.msra.mxu1 %v1895_v39  ;;  %314 = vmatprep.mubr.f32.mxu1 %v3296_v3  ;;  %v79_v5 = vld [vmem:[%s3288_s1 + $0x1a0] sm:$0xf]  ;;  %v1915_v6 = vpack.c.bf16 %v66_v4, %v55_v2  ;;  %v78_v7 = vld [vmem:[%s3288_s1 + $0x198] sm:$0xf]  ;;  %v37_v8 = vld [vmem:[%s3288_s1 + $0x50] sm:$0xff] }
  0x12   :  { %1898 = vmatprep.subr.bf16.mxu1 %v1897_v41  ;;  %1918 = vmatprep.subr.bf16.mxu0 %v1917_v44  ;;  %v48_v9 = vld [vmem:[%s3288_s1 + $0xa8] sm:$0xff]  ;;  %v77_v10 = vld [vmem:[%s3288_s1 + $0x190] sm:$0xf]  ;;  %v59_v12 = vld [vmem:[%s3288_s1 + $0x100] sm:$0xff] }
  0x13   :  { %1920 = vmatpush1.bf16.msra.mxu0 %v1919_v46  ;;  %527 = vmatprep.mubr.f32.mxu0 %v3296_v3  ;;  %v1926_v11 = vpack.c.bf16 %v48_v9, %v37_v8  ;;  %v70_v13 = vld [vmem:[%s3288_s1 + $0x158] sm:$0xff]  ;;  %v81_v16 = vld [vmem:[%s3288_s1 + $0x1b0] sm:$0xf]  ;;  %v906_v17 = vld [vmem:[%s3290_s3 + $0x80] sm:$0xff] }
  0x14   :  { %1922 = vmatprep.subr.bf16.mxu0 %v1921_v49  ;;  %v1929_v15 = vpack.c.bf16 %v70_v13, %v59_v12  ;;  %v907_v18 = vld [vmem:[%s3290_s3 + $0x88] sm:$0xff]  ;;  %v890_v20 = vld [vmem:[%s3290_s3] sm:$0xff]  ;;  %v908_v23 = vld [vmem:[%s3290_s3 + $0x90] sm:$0xff] }
  0x15   :  { %1900 = vmatpush1.bf16.msra.mxu1 %v1899_v52  ;;  %v1931_v19 = vpack.c.bf16 %v907_v18, %v906_v17  ;;  %v891_v21 = vld [vmem:[%s3290_s3 + $0x8] sm:$0xff]  ;;  %v909_v24 = vld [vmem:[%s3290_s3 + $0x98] sm:$0xff]  ;;  %v892_v26 = vld [vmem:[%s3290_s3 + $0x10] sm:$0xff] }
  0x16   :  { %1643 = vmatprep.subr.msk.mxu1 %vm145_vm0, %v74_v53  ;;  %v1933_v22 = vpack.c.bf16 %v891_v21, %v890_v20  ;;  %v1935_v25 = vpack.c.bf16 %v909_v24, %v908_v23  ;;  %v893_v27 = vld [vmem:[%s3290_s3 + $0x18] sm:$0xff]  ;;  %v910_v29 = vld [vmem:[%s3290_s3 + $0xa0] sm:$0xff]  ;;  %v911_v30 = vld [vmem:[%s3290_s3 + $0xa8] sm:$0xff] }
  0x17   :  { %1924 = vmatpush1.bf16.msra.mxu0 %v1923_v56  ;;  %v1937_v28 = vpack.c.bf16 %v893_v27, %v892_v26  ;;  %v1939_v31 = vpack.c.bf16 %v911_v30, %v910_v29  ;;  %v894_v32 = vld [vmem:[%s3290_s3 + $0x20] sm:$0xff]  ;;  %v895_v33 = vld [vmem:[%s3290_s3 + $0x28] sm:$0xff]  ;;  %v912_v41 = vld [vmem:[%s3290_s3 + $0xb0] sm:$0xff] }
  0x18   :  { %1652 = vmatprep.subr.msk.mxu0 %vm145_vm0, %v80_v61  ;;  %v1941_v34 = vpack.c.bf16 %v895_v33, %v894_v32  ;;  %v939_v36 = vld [vmem:[%s3290_s3 + $0x188] sm:$0xff]  ;;  %v922_v38 = vld [vmem:[%s3290_s3 + $0x100] sm:$0xff]  ;;  %v913_v42 = vld [vmem:[%s3290_s3 + $0xb8] sm:$0xff] }
  0x19   :  { %1644 = vmatpush1.msk.msra.mxu1 %vm145_vm0, %v73_v62  ;;  %v923_v39 = vld [vmem:[%s3290_s3 + $0x108] sm:$0xff]  ;;  %v1943_v43 = vpack.c.bf16 %v913_v42, %v912_v41  ;;  %v896_v44 = vld [vmem:[%s3290_s3 + $0x30] sm:$0xff]  ;;  %v897_v45 = vld [vmem:[%s3290_s3 + $0x38] sm:$0xff] }
  0x1a   :  { %1645 = vmatmul.mubr.msk.f32.vlgmr.msra.gmra.mrb[2].mxu1 %vm141_vm1, %v2289_v35  ;;  %1910 = vmatprep.subr.bf16.mxu1 %v1909_v63  ;;  %v1965_v40 = vpack.c.bf16 %v923_v39, %v922_v38  ;;  %v1945_v46 = vpack.c.bf16 %v897_v45, %v896_v44  ;;  %v940_v47 = vld [vmem:[%s3290_s3 + $0x190] sm:$0xff]  ;;  %v941_v48 = vld [vmem:[%s3290_s3 + $0x198] sm:$0xff]  ;;  %v914_v53 = vld [vmem:[%s3290_s3 + $0xc0] sm:$0xff] }
  0x1b   :  { %1912 = vmatpush1.bf16.msra.mxu1 %v1911_v0  ;;  %1653 = vmatpush1.msk.msra.mxu0 %vm145_vm0, %v79_v5  ;;  %v1967_v49 = vpack.c.bf16 %v941_v48, %v940_v47  ;;  %v924_v50 = vld [vmem:[%s3290_s3 + $0x110] sm:$0xff]  ;;  %v925_v51 = vld [vmem:[%s3290_s3 + $0x118] sm:$0xff]  ;;  %v915_v54 = vld [vmem:[%s3290_s3 + $0xc8] sm:$0xff] }
  0x1c   :  { %1914 = vmatprep.subr.bf16.mxu1 %v1913_v1  ;;  %456 = vmatprep.mubr.f32.mxu1 %v3296_v3  ;;  %v1969_v52 = vpack.c.bf16 %v925_v51, %v924_v50  ;;  %v1947_v55 = vpack.c.bf16 %v915_v54, %v914_v53  ;;  %v898_v56 = vld [vmem:[%s3290_s3 + $0x40] sm:$0xff]  ;;  %v899_v57 = vld [vmem:[%s3290_s3 + $0x48] sm:$0xff]  ;;  %v916_v1 = vld [vmem:[%s3290_s3 + $0xd0] sm:$0xff] }
  0x1d   :  { %1654 = vmatmul.mubr.msk.f32.vlgmr.msra.gmra.mrb[2].mxu0 %vm141_vm1, %v2289_v35  ;;  %1932 = vmatprep.subr.bf16.mxu0 %v1931_v19  ;;  %v1949_v58 = vpack.c.bf16 %v899_v57, %v898_v56  ;;  %v942_v59 = vld [vmem:[%s3290_s3 + $0x1a0] sm:$0xff]  ;;  %v943_v60 = vld [vmem:[%s3290_s3 + $0x1a8] sm:$0xff]  ;;  %v917_v2 = vld [vmem:[%s3290_s3 + $0xd8] sm:$0xff]  ;;  %v86_v57 = vlaneseq }
  0x1e   :  { %1934 = vmatpush3.bf16.msra.mxu0 %v1933_v22  ;;  %v1971_v61 = vpack.c.bf16 %v943_v60, %v942_v59  ;;  %v926_v62 = vld [vmem:[%s3290_s3 + $0x120] sm:$0xff]  ;;  %v927_v63 = vld [vmem:[%s3290_s3 + $0x128] sm:$0xff]  ;;  %v1951_v4 = vpack.c.bf16 %v917_v2, %v916_v1  ;;  %v900_v5 = vld [vmem:[%s3290_s3 + $0x50] sm:$0xff] }
  0x1f   :  { %1916 = vmatpush1.bf16.msra.mxu1 %v1915_v6  ;;  %1936 = vmatprep.subr.bf16.mxu0 %v1935_v25  ;;  %v1973_v0 = vpack.c.bf16 %v927_v63, %v926_v62  ;;  %v901_v6 = vld [vmem:[%s3290_s3 + $0x58] sm:$0xff]  ;;  %v944_v8 = vld [vmem:[%s3290_s3 + $0x1b0] sm:$0xff]  ;;  %v902_v18 = vld [vmem:[%s3290_s3 + $0x60] sm:$0xff] }
  0x20   :  { %1649 = vmatprep.subr.msk.mxu1 %vm145_vm0, %v78_v7  ;;  %v1953_v7 = vpack.c.bf16 %v901_v6, %v900_v5  ;;  %v945_v9 = vld [vmem:[%s3290_s3 + $0x1b8] sm:$0xff]  ;;  %v903_v19 = vld [vmem:[%s3290_s3 + $0x68] sm:$0xff]  ;;  %v946_v21 = vld [vmem:[%s3290_s3 + $0x1c0] sm:$0xff] }
  0x21   :  { %v929_v12 = vld [vmem:[%s3290_s3 + $0x138] sm:$0xff]  ;;  %v1957_v20 = vpack.c.bf16 %v903_v19, %v902_v18  ;;  %v947_v22 = vld [vmem:[%s3290_s3 + $0x1c8] sm:$0xff]  ;;  %v930_v24 = vld [vmem:[%s3290_s3 + $0x140] sm:$0xff] }
  0x22   :  { %1938 = vmatpush3.bf16.msra.mxu0 %v1937_v28  ;;  %v1979_v23 = vpack.c.bf16 %v947_v22, %v946_v21  ;;  %v931_v25 = vld [vmem:[%s3290_s3 + $0x148] sm:$0xff]  ;;  %v920_v27 = vld [vmem:[%s3290_s3 + $0xf0] sm:$0xff]  ;;  %v921_v28 = vld [vmem:[%s3290_s3 + $0xf8] sm:$0xff] }
  0x23   :  { %1650 = vmatpush1.msk.msra.mxu1 %vm145_vm0, %v77_v10  ;;  %1940 = vmatprep.subr.bf16.mxu0 %v1939_v31  ;;  %v1975_v10 = vpack.c.bf16 %v945_v9, %v944_v8  ;;  %v1981_v26 = vpack.c.bf16 %v931_v25, %v930_v24  ;;  %v1959_v29 = vpack.c.bf16 %v921_v28, %v920_v27  ;;  %v904_v30 = vld [vmem:[%s3290_s3 + $0x70] sm:$0xff]  ;;  %v905_v31 = vld [vmem:[%s3290_s3 + $0x78] sm:$0xff]  ;;  %v970_v39 = vld [vmem:[%s3290_s3 + $0x280] sm:$0xff] }
  0x24   :  { %1651 = vmatmul.mubr.msk.f32.vlgmr.msra.gmra.mrb[4].mxu1 %vm141_vm1, %v2289_v35  ;;  %1925 = vmatprep.subr.bf16.mxu1 %v3298_v14  ;;  %v1961_v32 = vpack.c.bf16 %v905_v31, %v904_v30  ;;  %v948_v33 = vld [vmem:[%s3290_s3 + $0x1d0] sm:$0xff]  ;;  %v950_v42 = vld [vmem:[%s3290_s3 + $0x1e0] sm:$0xff] }
  0x25   :  { %1927 = vmatpush3.bf16.msra.mxu1 %v1926_v11  ;;  %1862 = vmatprep.mubr.msk.f32.mxu1 %vm2162_vm2, %v3296_v3  ;;  %v928_v11 = vld [vmem:[%s3290_s3 + $0x130] sm:$0xff]  ;;  %v934_v45 = vld [vmem:[%s3290_s3 + $0x160] sm:$0xff] }
  0x26   :  { %1928 = vmatprep.subr.bf16.mxu1 %v3298_v14  ;;  %1942 = vmatpush3.bf16.msra.mxu0 %v1941_v34  ;;  %v1977_v13 = vpack.c.bf16 %v929_v12, %v928_v11  ;;  %v949_v34 = vld [vmem:[%s3290_s3 + $0x1d8] sm:$0xff]  ;;  %v952_v48 = vld [vmem:[%s3290_s3 + $0x1f0] sm:$0xff]  ;;  %v1002_v54 = vld [vmem:[%s3290_s3 + $0x380] sm:$0xff] }
  0x27   :  { %1944 = vmatprep.subr.bf16.mxu0 %v1943_v43  ;;  %v951_v43 = vld [vmem:[%s3290_s3 + $0x1e8] sm:$0xff]  ;;  %v936_v51 = vld [vmem:[%s3290_s3 + $0x170] sm:$0xff]  ;;  %v2617_v60 = vld [vmem:[%s3291_s2] sm:$0xff] }
  0x28   :  { %v1987_v44 = vpack.c.bf16 %v951_v43, %v950_v42 }
  0x29   :  { %1930 = vmatpush3.bf16.msra.mxu1 %v1929_v15  ;;  %v918_v15 = vld [vmem:[%s3290_s3 + $0xe0] sm:$0xff] }
  0x2a   :  { %1860 = vmatprep.subr.mxu1 %v3296_v3  ;;  %1946 = vmatpush3.bf16.msra.mxu0 %v1945_v46  ;;  %v935_v46 = vld [vmem:[%s3290_s3 + $0x168] sm:$0xff] }
  0x2b   :  { %1948 = vmatprep.subr.bf16.mxu0 %v1947_v55  ;;  %v1989_v47 = vpack.c.bf16 %v935_v46, %v934_v45  ;;  %v1003_v55 = vld [vmem:[%s3290_s3 + $0x388] sm:$0xff] }
  0x2c   :  { %v2027_v56 = vpack.c.bf16 %v1003_v55, %v1002_v54 }
  0x2d   :  { %1861 = vmatpush3.msk.msra.mxu1 %vm145_vm0, %v81_v16  ;;  %v919_v16 = vld [vmem:[%s3290_s3 + $0xe8] sm:$0xff] }
  0x2e   :  { %1863 = vmatmul.mubr.msk.f32.vlgmr.msra.gmra.mrb[6].mxu1 %vm141_vm1, %v2289_v35  ;;  %v938_v35 = vld [vmem:[%s3290_s3 + $0x180] sm:$0xff]  ;;  %1950 = vmatpush3.bf16.msra.mxu0 %v1949_v58  ;;  %v1955_v17 = vpack.c.bf16 %v919_v16, %v918_v15  ;;  %v2611_v58 = vshrl.u32 %v86_v57, 7 }
  0x2f   :  { %v1963_v37 = vpack.c.bf16 %v939_v36, %v938_v35  ;;  %1952 = vmatprep.subr.bf16.mxu0 %v1951_v4  ;;  %v1983_v35 = vpack.c.bf16 %v949_v34, %v948_v33  ;;  %v932_v36 = vld [vmem:[%s3290_s3 + $0x150] sm:$0xff]  ;;  %v2705_v57 = vld [vmem:[%s3290_s3 + $0x200] sm:$0xff] }
  0x30   :  { %v88_v59 = vsub.s32 0, %v2611_v58  ;;  %v92_v2 = vsub.s32 1, %v2611_v58  ;;  %v104_v6 = vsub.s32 4, %v2611_v58  ;;  %v96_v8 = vsub.s32 2, %v2611_v58 }
  0x31   :  { %1964 = vmatprep.subr.bf16.mxu1 %v1963_v37  ;;  %v933_v37 = vld [vmem:[%s3290_s3 + $0x158] sm:$0xff]  ;;  %v108_v12 = vsub.s32 5, %v2611_v58  ;;  %v100_v16 = vsub.s32 3, %v2611_v58 }
  0x32   :  { %1966 = vmatpush3.bf16.msra.mxu1 %v1965_v40  ;;  %1954 = vmatpush3.bf16.msra.mxu0 %v1953_v7  ;;  %v1985_v38 = vpack.c.bf16 %v933_v37, %v932_v36  ;;  %v971_v40 = vld [vmem:[%s3290_s3 + $0x288] sm:$0xff]  ;;  %v93_v9 = vrot.slane %v2617_v60, %v92_v2  ;;  %v105_v11 = vrot.slane %v2617_v60, %v104_v6  ;;  %v112_v36 = vsub.s32 6, %v2611_v58 }
  0x33   :  { %1968 = vmatprep.subr.bf16.mxu1 %v1967_v49  ;;  %1956 = vmatprep.subr.bf16.mxu0 %v1955_v17  ;;  %v1995_v41 = vpack.c.bf16 %v971_v40, %v970_v39  ;;  %v953_v49 = vld [vmem:[%s3290_s3 + $0x1f8] sm:$0xff]  ;;  %v97_v15 = vrot.slane %v2617_v60, %v96_v8  ;;  %v83_v17 = vld [vmem:[%s3291_s2 + $0x8] sm:$0x7]  ;;  %v109_v21 = vrot.slane %v2617_v60, %v108_v12 }
  0x34   :  { %v1991_v50 = vpack.c.bf16 %v953_v49, %v952_v48  ;;  %v101_v25 = vrot.slane %v2617_v60, %v100_v16  ;;  %v125_v33 = vrot.slane %v83_v17, %v92_v2  ;;  %v113_v45 = vrot.slane %v2617_v60, %v112_v36  ;;  %v2722_v2 = vld [vmem:[%s3290_s3 + $0x298] sm:$0xff] }
  0x35   :  { %v116_v49 = vsub.s32 7, %v2611_v58 }
  0x36   :  { %1970 = vmatpush3.bf16.msra.mxu1 %v1969_v52  ;;  %1958 = vmatpush3.bf16.msra.mxu0 %v1957_v20  ;;  %v937_v52 = vld [vmem:[%s3290_s3 + $0x178] sm:$0xff] }
  0x37   :  { %1972 = vmatprep.subr.bf16.mxu1 %v1971_v61  ;;  %1960 = vmatprep.subr.bf16.mxu0 %v1959_v29  ;;  %v1993_v53 = vpack.c.bf16 %v937_v52, %v936_v51  ;;  %v89_v61 = vrot.slane %v2617_v60, %v88_v59 }
  0x3a   :  { %1974 = vmatpush3.bf16.msra.mxu1 %v1973_v0  ;;  %1962 = vmatpush3.bf16.msra.mxu0 %v1961_v32 }
  0x3b   :  { %1976 = vmatprep.subr.bf16.mxu1 %v1975_v10  ;;  %1996 = vmatprep.subr.bf16.mxu0 %v1995_v41 }
  0x3e   :  { %1978 = vmatpush3.bf16.msra.mxu1 %v1977_v13 }
  0x3f   :  { %1980 = vmatprep.subr.bf16.mxu1 %v1979_v23  ;;  %v121_v23 = vrot.slane %v83_v17, %v88_v59  ;;  %v2710_v59 = vld [vmem:[%s3290_s3 + $0x208] sm:$0xff] }
  0x42   :  { %1982 = vmatpush3.bf16.msra.mxu1 %v1981_v26 }
  0x43   :  { %1984 = vmatprep.subr.bf16.mxu1 %v1983_v35 }
  0x46   :  { %1986 = vmatpush3.bf16.msra.mxu1 %v1985_v38 }
  0x47   :  { %1988 = vmatprep.subr.bf16.mxu1 %v1987_v44 }
  0x4a   :  { %1990 = vmatpush3.bf16.msra.mxu1 %v1989_v47 }
  0x4b   :  { %1992 = vmatprep.subr.bf16.mxu1 %v1991_v50 }
  0x4e   :  { %1994 = vmatpush3.bf16.msra.mxu1 %v1993_v53 }
  0x4f   :  { %2028 = vmatprep.subr.bf16.mxu1 %v2027_v56 }
  0xe2   :  { %v245_v62 = vpop.f32.mrb[0].mxu1 }
  0xe3   :  { %v2620_v63 = vadd.f32 %v245_v62, %v89_v61  ;;  %v387_v0 = vpop.f32.mrb[0].mxu0  ;;  %v247_v1 = vpop.f32.mrb[1].mxu1 }
  0xe4   :  { %v389_v4 = vpop.f32.mrb[1].mxu0  ;;  %v2642_v18 = vadd.f32 %v247_v1, %v93_v9  ;;  %v2644_v19 = vadd.f32 %v387_v0, %v105_v11  ;;  %v117_v0 = vrot.slane %v2617_v60, %v116_v49  ;;  %v2717_v1 = vld [vmem:[%s3290_s3 + $0x290] sm:$0xff]  ;;  %v2735_v60 = vld [vmem:[%s3290_s3 + $0x218] sm:$0xff]  ;;  %v2740_v9 = vld [vmem:[%s3290_s3 + $0x2a0] sm:$0xff] }
  0xe5   :  { %v2624_v5 = vmul.f32 0.70710677, %v2620_v63  ;;  %v2659_v31 = vadd.f32 %v389_v4, %v109_v21  ;;  %v2727_v4 = vld [vmem:[%s3290_s3 + $0x210] sm:$0xff]  ;;  %v129_v21 = vrot.slane %v83_v17, %v96_v8 }
  0xe6   :  { %3318 = vst [vmem:[#allocation2_spill] sm:$0xff] %v2644_v19  ;;  %v2651_v26 = vmul.f32 0.70710677, %v2642_v18  ;;  %v2654_v28 = vmul.f32 0.70710677, %v2644_v19 }
  0xe7   :  { %v2628_v7 = vand.u32 2147483647, %v2624_v5  ;;  %v2677_v40 = vmul.f32 0.70710677, %v2659_v31  ;;  %vm626_vm3 = vcmp.ge.f32.partialorder %v2624_v5, 0.0 }
  0xe8   :  { %3319 = vst [vmem:[#allocation3_spill] sm:$0xff] %v2654_v28  ;;  %v2670_v37 = vand.u32 2147483647, %v2651_v26  ;;  %v2673_v38 = vand.u32 2147483647, %v2654_v28  ;;  %vm627_vm4 = vcmp.ge.f32.partialorder %v2651_v26, 0.0 }
  0xe9   :  { %v659_v10 = vmul.f32 0.3275911, %v2628_v7  ;;  %v2692_v53 = vand.u32 2147483647, %v2677_v40  ;;  %v791_v16 = vsub.f32 0.0, %v2628_v7  ;;  %vm631_vm5 = vcmp.ge.f32.partialorder %v2677_v40, 0.0 }
  0xea   :  { %v660_v48 = vmul.f32 0.3275911, %v2670_v37  ;;  %v663_v51 = vmul.f32 0.3275911, %v2673_v38 }
  0xeb   :  { %v670_v13 = vadd.f32 1.0, %v659_v10  ;;  %v2745_v10 = vld [vmem:[%s3290_s3 + $0x2a8] sm:$0xff]  ;;  %v664_v12 = vmul.f32 0.3275911, %v2692_v53 }
  0xec   :  { %v671_v62 = vadd.f32 1.0, %v660_v48  ;;  %v674_v11 = vadd.f32 1.0, %v663_v51  ;;  %v802_v51 = vmul.f32 %v791_v16, %v2628_v7  ;;  %v2812_v16 = vmul.f32 0.5, %v2659_v31 }
  0xed   :  { %2104 = vrcp.f32 %v670_v13  ;;  %v316_v20 = vpop.f32.mrb[2].mxu1 }
  0xee   :  { %v318_v22 = vpop.f32.mrb[3].mxu1  ;;  %v2647_v24 = vadd.f32 %v316_v20, %v97_v15  ;;  %v2754_v15 = vld [vmem:[%s3290_s3 + $0x300] sm:$0xff]  ;;  %v813_v3 = vmul.f32 1.442695, %v802_v51 }
  0xef   :  { %v2666_v35 = vadd.f32 %v318_v22, %v101_v25  ;;  %v2770_v25 = vld [vmem:[%s3290_s3 + $0x390] sm:$0xff] }
  0xf0   :  { %v529_v27 = vpop.f32.mrb[2].mxu0  ;;  %v2657_v29 = vmul.f32 0.70710677, %v2647_v24  ;;  %v2864_v40 = vmul.f32 0.5, %v2647_v24 }
  0xf1   :  { %v531_v30 = vpop.f32.mrb[3].mxu0  ;;  %v2661_v32 = vadd.f32 %v529_v27, %v121_v23  ;;  %v2684_v44 = vmul.f32 0.70710677, %v2666_v35  ;;  %v2765_v23 = vld [vmem:[%s3290_s3 + $0x308] sm:$0xff]  ;;  %v2775_v27 = vld [vmem:[%s3290_s3 + $0x398] sm:$0xff] }
  0xf2   :  { %v2664_v34 = vand.u32 2147483647, %v2657_v29  ;;  %v2679_v41 = vadd.f32 %v531_v30, %v125_v33  ;;  %vm628_vm6 = vcmp.ge.f32.partialorder %v2657_v29, 0.0 }
  0xf3   :  { %3320 = vst [vmem:[#allocation4_spill] sm:$0xff] %v2661_v32  ;;  %v2698_v55 = vand.u32 2147483647, %v2684_v44  ;;  %vm629_vm7 = vcmp.ge.f32.partialorder %v2684_v44, 0.0 }
  0xf4   :  { %v661_v39 = vmul.f32 0.3275911, %v2664_v34  ;;  %3321 = vst [vmem:[#allocation5_spill] sm:$0xff] %v2679_v41  ;;  %v2695_v54 = vmul.f32 0.70710677, %v2679_v41 }
  0xf5   :  { %v662_v20 = vmul.f32 0.3275911, %v2698_v55 }
  0xf6   :  { %v672_v43 = vadd.f32 1.0, %v661_v39  ;;  %3322 = vst [vmem:[#allocation6_spill] sm:$0xff] %v2695_v54  ;;  %v2749_v13 = vand.u32 2147483647, %v2695_v54 }
  0xf7   :  { %v2681_v42 = vpop.eup %2104  ;;  %v458_v46 = vpop.f32.mrb[4].mxu1 }
  0xf8   :  { %v692_v47 = vmul.f32 1.0614054, %v2681_v42  ;;  %v460_v50 = vpop.f32.mrb[5].mxu1  ;;  %2106 = vrcp.f32 %v672_v43  ;;  %v2700_v56 = vadd.f32 %v458_v46, %v113_v45  ;;  %v668_v30 = vmul.f32 0.3275911, %v2749_v13 }
  0xf9   :  { %2108 = vrcp.f32 %v671_v62  ;;  %v2780_v17 = vadd.f32 %v460_v50, %v117_v0  ;;  %v675_v45 = vadd.f32 1.0, %v664_v12  ;;  %v2796_v50 = vmul.f32 0.5, %v2620_v63 }
  0xfa   :  { %v703_v52 = vadd.f32 -1.4531521, %v692_v47  ;;  %3323 = vst [vmem:[#allocation7_spill] sm:$0xff] %v2700_v56  ;;  %v2730_v6 = vmul.f32 0.70710677, %v2700_v56  ;;  %2110 = vrcp.f32 %v674_v11  ;;  %v792_v63 = vsub.f32 0.0, %v2670_v37 }
  0xfb   :  { %v2804_v12 = vmul.f32 0.70710677, %v2780_v17  ;;  %v679_v7 = vadd.f32 1.0, %v668_v30  ;;  %2112 = vrcp.f32 %v675_v45  ;;  %v795_v30 = vsub.f32 0.0, %v2673_v38 }
  0xfc   :  { %v714_v61 = vmul.f32 %v2681_v42, %v703_v52  ;;  %3324 = vst [vmem:[#allocation8_spill] sm:$0xff] %v2730_v6  ;;  %v2778_v8 = vand.u32 2147483647, %v2730_v6  ;;  %v793_v52 = vsub.f32 0.0, %v2664_v34  ;;  %v803_v31 = vmul.f32 %v792_v63, %v2670_v37 }
  0xfd   :  { %v655_v47 = vand.u32 2147483647, %v2804_v12  ;;  %vm633_vm8 = vcmp.ge.f32.partialorder %v2804_v12, 0.0  ;;  %v607_v12 = vmul.f32 0.5, %v2666_v35  ;;  %v959_v35 = vld [vmem:[%s3290_s3 + $0x228] sm:$0xff] }
  0xfe   :  { %v725_v58 = vadd.f32 1.4214138, %v714_v61  ;;  %v673_v61 = vadd.f32 1.0, %v662_v20  ;;  %v665_v11 = vmul.f32 0.3275911, %v2778_v8  ;;  %v804_v14 = vmul.f32 %v793_v52, %v2664_v34 }
  0xff   :  { %v666_v45 = vmul.f32 0.3275911, %v655_v47  ;;  %v796_v34 = vsub.f32 0.0, %v2692_v53 }
 0x100   :  { %v736_v62 = vmul.f32 %v2681_v42, %v725_v58  ;;  %2114 = vrcp.f32 %v673_v61  ;;  %v676_v43 = vadd.f32 1.0, %v665_v11  ;;  %v817_v52 = vmul.f32 1.442695, %v804_v14 }
 0x101   :  { %v600_v33 = vpop.f32.mrb[6].mxu1  ;;  %2116 = vrcp.f32 %v679_v7  ;;  %v794_v61 = vsub.f32 0.0, %v2698_v55  ;;  %v806_v7 = vmul.f32 %v795_v30, %v2673_v38  ;;  %v3300_v14 = vmov -1.0  }
 0x102   :  { %v1864_v48 = vpop.f32.mrb[7].mxu1  ;;  %v2793_v49 = vpop.eup %2106  ;;  %v2814_v58 = vadd.f32 %v600_v33, %v129_v21  ;;  %v747_v46 = vadd.f32 -0.28449672, %v736_v62  ;;  %2118 = vpow2.f32 %v813_v3  ;;  %v677_v62 = vadd.f32 1.0, %v666_v45 }
 0x103   :  { %v694_v0 = vmul.f32 1.0614054, %v2793_v49  ;;  %v2808_v48 = vmul.f32 0.5, %v2642_v18  ;;  %v2822_v21 = vpop.eup %2108  ;;  %2120 = vrcp.f32 %v676_v43  ;;  %v2850_v38 = vsel %vm627_vm4, 1.0, %v3300_v14 }
 0x104   :  { %3325 = vst [vmem:[#allocation9_spill] sm:$0xff] %v2814_v58  ;;  %v2827_v51 = vmul.f32 0.70710677, %v2814_v58  ;;  %v758_v37 = vmul.f32 %v2681_v42, %v747_v46  ;;  %2122 = vrcp.f32 %v677_v62  ;;  %v693_v3 = vmul.f32 1.0614054, %v2822_v21 }
 0x105   :  { %v705_v20 = vadd.f32 -1.4531521, %v694_v0  ;;  %v2830_v0 = vpop.eup %2110  ;;  %v807_v46 = vmul.f32 %v796_v34, %v2692_v53  ;;  %v2855_v30 = vsel %vm631_vm5, 1.0, %v3300_v14  ;;  %v805_v5 = vmul.f32 %v794_v61, %v2698_v55 }
 0x106   :  { %3326 = vst [vmem:[#allocation10_spill] sm:$0xff] %v2827_v51  ;;  %v2835_v63 = vand.u32 2147483647, %v2827_v51  ;;  %v769_v53 = vadd.f32 0.2548296, %v758_v37  ;;  %2124 = vpow2.f32 %v817_v52  ;;  %v798_v34 = vsub.f32 0.0, %v655_v47 }
 0x107   :  { %v716_v18 = vmul.f32 %v2793_v49, %v705_v20  ;;  %v815_v20 = vmul.f32 1.442695, %v803_v31  ;;  %v2858_v31 = vpop.eup %2112  ;;  %v821_v39 = vmul.f32 1.442695, %v806_v7  ;;  %v704_v36 = vadd.f32 -1.4531521, %v693_v3 }
 0x108   :  { %v669_v43 = vmul.f32 0.3275911, %v2835_v63  ;;  %v823_v22 = vmul.f32 1.442695, %v807_v46  ;;  %v819_v52 = vmul.f32 1.442695, %v805_v5 }
 0x109   :  { %v727_v33 = vadd.f32 1.4214138, %v716_v18  ;;  %v2842_v18 = vsel %vm626_vm3, 1.0, %v3300_v14  ;;  %2126 = vpow2.f32 %v815_v20  ;;  %v2870_v37 = vmul.f32 0.70710677, %v2661_v32 }
 0x10a   :  { %v680_v62 = vadd.f32 1.0, %v669_v43  ;;  %v715_v7 = vmul.f32 %v2822_v21, %v704_v36  ;;  %v780_v20 = vmul.f32 %v2681_v42, %v769_v53  ;;  %v697_v3 = vmul.f32 1.0614054, %v2858_v31 }
 0x10b   :  { %v738_v11 = vmul.f32 %v2793_v49, %v727_v33  ;;  %v696_v33 = vmul.f32 1.0614054, %v2830_v0  ;;  %3327 = vst [vmem:[#allocation11_spill] sm:$0xff] %v2870_v37  ;;  %v2877_v29 = vsel %vm628_vm6, 1.0, %v3300_v14 }
 0x10c   :  { %2128 = vrcp.f32 %v680_v62  ;;  %v708_v62 = vadd.f32 -1.4531521, %v697_v3 }
 0x10d   :  { %v749_v45 = vadd.f32 -0.28449672, %v738_v11  ;;  %v2860_v11 = vpop.eup %2114  ;;  %v707_v61 = vadd.f32 -1.4531521, %v696_v33  ;;  %v726_v33 = vadd.f32 1.4214138, %v715_v7  ;;  %2130 = vpow2.f32 %v823_v22 }
 0x10e   :  { %v2867_v55 = vpop.eup %2116  ;;  %v695_v24 = vmul.f32 1.0614054, %v2860_v11  ;;  %2132 = vpow2.f32 %v819_v52  ;;  %v719_v7 = vmul.f32 %v2858_v31, %v708_v62 }
 0x10f   :  { %v760_v26 = vmul.f32 %v2793_v49, %v749_v45  ;;  %v809_v45 = vmul.f32 %v798_v34, %v655_v47  ;;  %v2119_v46 = vpop.eup %2118  ;;  %v701_v42 = vmul.f32 1.0614054, %v2867_v55  ;;  %v718_v53 = vmul.f32 %v2830_v0, %v707_v61 }
 0x110   :  { %v2880_v5 = vpop.eup %2120  ;;  %v706_v36 = vadd.f32 -1.4531521, %v695_v24  ;;  %v2887_v34 = vand.u32 2147483647, %v2870_v37  ;;  %v835_v14 = vmul.f32 %v2119_v46, %v780_v20  ;;  %2134 = vpow2.f32 %v821_v39 }
 0x111   :  { %v771_v43 = vadd.f32 0.2548296, %v760_v26  ;;  %v2883_v47 = vpop.eup %2122  ;;  %v737_v26 = vmul.f32 %v2822_v21, %v726_v33  ;;  %v827_v32 = vmul.f32 1.442695, %v809_v45  ;;  %v698_v24 = vmul.f32 1.0614054, %v2880_v5 }
 0x112   :  { %3328 = vst [vmem:[#allocation12_spill] sm:$0xff] %v2887_v34  ;;  %v717_v22 = vmul.f32 %v2860_v11, %v706_v36  ;;  %v699_v56 = vmul.f32 1.0614054, %v2883_v47  ;;  %v2125_v61 = vpop.eup %2124  ;;  %v730_v52 = vadd.f32 1.4214138, %v719_v7  ;;  %v3329_v33 = vmov -1.0  }
 0x113   :  { %v782_v3 = vmul.f32 %v2793_v49, %v771_v43  ;;  %v748_v58 = vadd.f32 -0.28449672, %v737_v26  ;;  %v712_v19 = vadd.f32 -1.4531521, %v701_v42  ;;  %v2127_v41 = vpop.eup %2126  ;;  %v2898_v20 = vsel %vm629_vm7, 1.0, %v3329_v33 }
 0x114   :  { %v728_v37 = vadd.f32 1.4214138, %v717_v22  ;;  %v667_v45 = vmul.f32 0.3275911, %v2887_v34  ;;  %v710_v46 = vadd.f32 -1.4531521, %v699_v56  ;;  %v741_v39 = vmul.f32 %v2858_v31, %v730_v52 }
 0x115   :  { %v759_v49 = vmul.f32 %v2822_v21, %v748_v58  ;;  %v846_v62 = vsub.f32 1.0, %v835_v14  ;;  %v729_v36 = vadd.f32 1.4214138, %v718_v53  ;;  %v837_v42 = vmul.f32 %v2125_v61, %v782_v3 }
 0x116   :  { %v2902_v43 = vpop.eup %2128  ;;  %v739_v26 = vmul.f32 %v2860_v11, %v728_v37  ;;  %2136 = vpow2.f32 %v827_v32  ;;  %v721_v44 = vmul.f32 %v2883_v47, %v710_v46  ;;  %v709_v22 = vadd.f32 -1.4531521, %v698_v24 }
 0x117   :  { %v770_v7 = vadd.f32 0.2548296, %v759_v49  ;;  %v752_v51 = vadd.f32 -0.28449672, %v741_v39  ;;  %v723_v34 = vmul.f32 %v2867_v55, %v712_v19  ;;  %v678_v58 = vadd.f32 1.0, %v667_v45  ;;  %v2131_v28 = vpop.eup %2130 }
 0x118   :  { %v750_v6 = vadd.f32 -0.28449672, %v739_v26  ;;  %v702_v56 = vmul.f32 1.0614054, %v2902_v43  ;;  %v732_v53 = vadd.f32 1.4214138, %v721_v44  ;;  %v740_v52 = vmul.f32 %v2830_v0, %v729_v36  ;;  %v2133_v24 = vpop.eup %2132 }
 0x119   :  { %v781_v14 = vmul.f32 %v2822_v21, %v770_v7  ;;  %v800_v37 = vsub.f32 0.0, %v2749_v13  ;;  %v763_v32 = vmul.f32 %v2858_v31, %v752_v51  ;;  %v857_v61 = vmul.f32 %v846_v62, %v2842_v18 }
 0x11a   :  { %v761_v3 = vmul.f32 %v2860_v11, %v750_v6  ;;  %v848_v49 = vsub.f32 1.0, %v837_v42  ;;  %v743_v45 = vmul.f32 %v2883_v47, %v732_v53  ;;  %v720_v46 = vmul.f32 %v2880_v5, %v709_v22  ;;  %v2917_v54 = vpop.eup %2134 }
 0x11b   :  { %v836_v19 = vmul.f32 %v2127_v41, %v781_v14  ;;  %v774_v21 = vadd.f32 0.2548296, %v763_v32  ;;  %v734_v26 = vadd.f32 1.4214138, %v723_v34  ;;  %2138 = vrcp.f32 %v678_v58 }
 0x11c   :  { %v772_v39 = vadd.f32 0.2548296, %v761_v3  ;;  %v713_v36 = vadd.f32 -1.4531521, %v702_v56  ;;  %v754_v44 = vadd.f32 -0.28449672, %v743_v45  ;;  %v811_v51 = vmul.f32 %v800_v37, %v2749_v13 }
 0x11d   :  { %v847_v7 = vsub.f32 1.0, %v836_v19  ;;  %v797_v6 = vsub.f32 0.0, %v2778_v8  ;;  %v785_v18 = vmul.f32 %v2858_v31, %v774_v21  ;;  %v868_v62 = vadd.f32 1.0, %v857_v61 }
 0x11e   :  { %v783_v41 = vmul.f32 %v2860_v11, %v772_v39  ;;  %v751_v42 = vadd.f32 -0.28449672, %v740_v52  ;;  %v765_v34 = vmul.f32 %v2883_v47, %v754_v44  ;;  %v859_v58 = vmul.f32 %v848_v49, %v2877_v29 }
 0x11f   :  { %v858_v22 = vmul.f32 %v847_v7, %v2850_v38  ;;  %v731_v56 = vadd.f32 1.4214138, %v720_v46  ;;  %v840_v14 = vmul.f32 %v2131_v28, %v785_v18  ;;  %v724_v3 = vmul.f32 %v2902_v43, %v713_v36 }
 0x120   :  { %v838_v53 = vmul.f32 %v2133_v24, %v783_v41  ;;  %v2137_v32 = vpop.eup %2136  ;;  %v776_v13 = vadd.f32 0.2548296, %v765_v34  ;;  %v745_v31 = vmul.f32 %v2867_v55, %v734_v26  ;;  %v808_v11 = vmul.f32 %v797_v6, %v2778_v8  ;;  %v976_v6 = vld [vmem:[%s3290_s3 + $0x2b0] sm:$0xff]  ;;  %v989_v34 = vld [vmem:[%s3290_s3 + $0x318] sm:$0xff] }
 0x121   :  { %v869_v19 = vadd.f32 1.0, %v858_v22  ;;  %v831_v37 = vmul.f32 1.442695, %v811_v51  ;;  %v851_v52 = vsub.f32 1.0, %v840_v14  ;;  %v801_v38 = vsub.f32 0.0, %v2835_v63  ;;  %v988_v22 = vld [vmem:[%s3290_s3 + $0x310] sm:$0xff] }
 0x122   :  { %v849_v61 = vsub.f32 1.0, %v838_v53  ;;  %v787_v28 = vmul.f32 %v2883_v47, %v776_v13  ;;  %v879_v24 = vmul.f32 %v868_v62, %v2796_v50  ;;  %v742_v49 = vmul.f32 %v2880_v5, %v731_v56 }
 0x123   :  { %v880_v29 = vmul.f32 %v869_v19, %v2808_v48  ;;  %v862_v45 = vmul.f32 %v851_v52, %v2855_v30  ;;  %v870_v8 = vadd.f32 1.0, %v859_v58  ;;  %v735_v21 = vadd.f32 1.4214138, %v724_v3  ;;  %v960_v3 = vld [vmem:[%s3290_s3 + $0x230] sm:$0xff]  ;;  %v961_v19 = vld [vmem:[%s3290_s3 + $0x238] sm:$0xff]  ;;  %v979_v52 = vld [vmem:[%s3290_s3 + $0x2c8] sm:$0xff] }
 0x124   :  { %v860_v46 = vmul.f32 %v849_v61, %v2898_v20  ;;  %v842_v39 = vmul.f32 %v2137_v32, %v787_v28  ;;  %v756_v26 = vadd.f32 -0.28449672, %v745_v31  ;;  %v644_v36 = vsel %vm633_vm8, 1.0, %v3329_v33  ;;  %v958_v20 = vld [vmem:[%s3290_s3 + $0x220] sm:$0xff] }
 0x125   :  { %1127 = vmatprep.mubr.f32.mxu0 %v880_v29  ;;  %v873_v48 = vadd.f32 1.0, %v862_v45  ;;  %v2939_v7 = vpop.eup %2138  ;;  %v762_v50 = vmul.f32 %v2830_v0, %v751_v42  ;;  %v825_v44 = vmul.f32 1.442695, %v808_v11  ;;  %2140 = vpow2.f32 %v831_v37  ;;  %v977_v42 = vld [vmem:[%s3290_s3 + $0x2b8] sm:$0xff] }
 0x126   :  { %1128 = vmatmul.mubr.f32.vlgmr.msra.gmra.mrb[4].mxu0 %v879_v24  ;;  %v871_v47 = vadd.f32 1.0, %v860_v46  ;;  %v3330_v30 = vpack.c.bf16 %v2710_v59, %v2705_v57  ;;  %v853_v51 = vsub.f32 1.0, %v842_v39  ;;  %v753_v18 = vadd.f32 -0.28449672, %v742_v49  ;;  %v1008_v24 = vld [vmem:[%s3290_s3 + $0x3b0] sm:$0xff]  ;;  %v1009_v49 = vld [vmem:[%s3290_s3 + $0x3b8] sm:$0xff] }
 0x127   :  { %v812_v41 = vmul.f32 %v801_v38, %v2835_v63  ;;  %v884_v62 = vmul.f32 %v873_v48, %v2812_v16  ;;  %v3331_v57 = vpack.c.bf16 %v2722_v2, %v2717_v1  ;;  %v881_v63 = vmul.f32 %v870_v8, %v2864_v40  ;;  %v1006_v1 = vld [vmem:[%s3290_s3 + $0x3a0] sm:$0xff]  ;;  %v1007_v2 = vld [vmem:[%s3290_s3 + $0x3a8] sm:$0xff]  ;;  %v981_v48 = vld [vmem:[%s3290_s3 + $0x2d8] sm:$0xff] }
 0x128   :  { %1998 = vmatpush3.bf16.msra.mxu0 %v3330_v30  ;;  %v882_v59 = vmul.f32 %v871_v47, %v607_v12  ;;  %v746_v16 = vmul.f32 %v2902_v43, %v735_v21  ;;  %v864_v58 = vmul.f32 %v853_v51, %v644_v36  ;;  %v767_v56 = vmul.f32 %v2867_v55, %v756_v26  ;;  %v962_v8 = vld [vmem:[%s3290_s3 + $0x240] sm:$0xff]  ;;  %v963_v21 = vld [vmem:[%s3290_s3 + $0x248] sm:$0xff]  ;;  %v980_v26 = vld [vmem:[%s3290_s3 + $0x2d0] sm:$0xff] }
 0x129   :  { %2000 = vmatprep.subr.bf16.mxu0 %v3331_v57  ;;  %1267 = vmatprep.mubr.f32.mxu0 %v884_v62  ;;  %v2005_v14 = vpack.c.bf16 %v959_v35, %v958_v20  ;;  %v611_v53 = vmul.f32 0.5, %v2780_v17  ;;  %v3332_v40 = vpack.c.bf16 %v2735_v60, %v2727_v4  ;;  %v2007_v32 = vpack.c.bf16 %v977_v42, %v976_v6  ;;  %v978_v60 = vld [vmem:[%s3290_s3 + $0x2c0] sm:$0xff]  ;;  %v1011_v35 = vld [vmem:[%s3290_s3 + $0x3c8] sm:$0xff]  ;;  %v964_v51 = vld [vmem:[%s3290_s3 + $0x250] sm:$0xff] }
 0x12a   :  { %1197 = vmatprep.mubr.f32.mxu1 %v882_v59  ;;  %v2033_v13 = vpack.c.bf16 %v989_v34, %v988_v22  ;;  %v875_v31 = vadd.f32 1.0, %v864_v58  ;;  %v773_v11 = vadd.f32 0.2548296, %v762_v50  ;;  %2142 = vpow2.f32 %v825_v44  ;;  %v992_v50 = vld [vmem:[%s3290_s3 + $0x330] sm:$0xff]  ;;  %v993_v44 = vld [vmem:[%s3290_s3 + $0x338] sm:$0xff]  ;;  %v1010_v20 = vld [vmem:[%s3290_s3 + $0x3c0] sm:$0xff] }
 0x12b   :  { %1198 = vmatmul.mubr.f32.vlgmr.msra.gmra.mrb[8].mxu1 %v881_v63  ;;  %v833_v37 = vmul.f32 1.442695, %v812_v41  ;;  %v3333_v17 = vpack.c.bf16 %v2745_v10, %v2740_v9  ;;  %v3334_v4 = vpack.c.bf16 %v2765_v23, %v2754_v15  ;;  %v2035_v61 = vpack.c.bf16 %v1007_v2, %v1006_v1  ;;  %v990_v10 = vld [vmem:[%s3290_s3 + $0x320] sm:$0xff]  ;;  %v991_v15 = vld [vmem:[%s3290_s3 + $0x328] sm:$0xff]  ;;  %v965_v62 = vld [vmem:[%s3290_s3 + $0x258] sm:$0xff] }
 0x12c   :  { %2002 = vmatpush3.bf16.msra.mxu0 %v3332_v40  ;;  %v764_v38 = vmul.f32 %v2880_v5, %v753_v18  ;;  %v757_v29 = vadd.f32 -0.28449672, %v746_v16  ;;  %v3335_v9 = vpack.c.bf16 %v2775_v27, %v2770_v25  ;;  %v886_v23 = vmul.f32 %v875_v31, %v611_v53  ;;  %v982_v59 = vld [vmem:[%s3290_s3 + $0x2e0] sm:$0xff]  ;;  %v983_v42 = vld [vmem:[%s3290_s3 + $0x2e8] sm:$0xff]  ;;  %v1012_v58 = vld [vmem:[%s3290_s3 + $0x3d0] sm:$0xff] }
 0x12d   :  { %2004 = vmatprep.subr.bf16.mxu0 %v3333_v17  ;;  %2030 = vmatpush3.bf16.msra.mxu1 %v3334_v4  ;;  %v778_v28 = vadd.f32 0.2548296, %v767_v56  ;;  %v2009_v25 = vpack.c.bf16 %v961_v19, %v960_v3  ;;  %v2011_v27 = vpack.c.bf16 %v979_v52, %v978_v60  ;;  %v784_v45 = vmul.f32 %v2830_v0, %v773_v11  ;;  %v994_v63 = vld [vmem:[%s3290_s3 + $0x340] sm:$0xff]  ;;  %v995_v16 = vld [vmem:[%s3290_s3 + $0x348] sm:$0xff]  ;;  %v984_v11 = vld [vmem:[%s3290_s3 + $0x2f0] sm:$0xff] }
 0x12e   :  { %2032 = vmatprep.subr.bf16.mxu1 %v3335_v9  ;;  %1337 = vmatprep.mubr.f32.mxu1 %v886_v23  ;;  %v700_v46 = vmul.f32 1.0614054, %v2939_v7  ;;  %2144 = vpow2.f32 %v833_v37  ;;  %v2037_v39 = vpack.c.bf16 %v991_v15, %v990_v10  ;;  %v775_v0 = vadd.f32 0.2548296, %v764_v38  ;;  %v3336_v56 = vld [vmem:[#allocation6_spill] sm:$0xff]  ;;  %v3337_v40 = vld [vmem:[#allocation3_spill] sm:$0xff] }
 0x12f   :  { %v2141_v12 = vpop.eup %2140  ;;  %v768_v36 = vmul.f32 %v2902_v43, %v757_v29  ;;  %v2039_v47 = vpack.c.bf16 %v1009_v49, %v1008_v24  ;;  %v789_v30 = vmul.f32 %v2867_v55, %v778_v28  ;;  %v2013_v6 = vpack.c.bf16 %v963_v21, %v962_v8  ;;  %v966_v19 = vld [vmem:[%s3290_s3 + $0x260] sm:$0xff]  ;;  %v985_v4 = vld [vmem:[%s3290_s3 + $0x2f8] sm:$0xff]  ;;  %v996_v52 = vld [vmem:[%s3290_s3 + $0x350] sm:$0xff] }
 0x130   :  { %2006 = vmatpush3.bf16.msra.mxu0 %v2005_v14  ;;  %v839_v18 = vmul.f32 %v2917_v54, %v784_v45  ;;  %v711_v41 = vadd.f32 -1.4531521, %v700_v46  ;;  %v2015_v55 = vpack.c.bf16 %v981_v48, %v980_v26  ;;  %v2041_v57 = vpack.c.bf16 %v993_v44, %v992_v50  ;;  %v1014_v9 = vld [vmem:[%s3290_s3 + $0x3e0] sm:$0xff]  ;;  %v1015_v10 = vld [vmem:[%s3290_s3 + $0x3e8] sm:$0xff]  ;;  %v3338_v23 = vld [vmem:[#allocation12_spill] sm:$0xff] }
 0x131   :  { %2008 = vmatprep.subr.bf16.mxu0 %v2007_v32  ;;  %2034 = vmatpush3.bf16.msra.mxu1 %v2033_v13  ;;  %v786_v22 = vmul.f32 %v2880_v5, %v775_v0  ;;  %v779_v54 = vadd.f32 0.2548296, %v768_v36  ;;  %v2043_v34 = vpack.c.bf16 %v1011_v35, %v1010_v20  ;;  %v844_v1 = vmul.f32 %v2141_v12, %v789_v30  ;;  %v1013_v5 = vld [vmem:[%s3290_s3 + $0x3d8] sm:$0xff]  ;;  %v967_v13 = vld [vmem:[%s3290_s3 + $0x268] sm:$0xff]  ;;  %v3339_v24 = vld [vmem:[#allocation8_spill] sm:$0xff] }
 0x132   :  { %2036 = vmatprep.subr.bf16.mxu1 %v2035_v61  ;;  %vm635_vm9 = vcmp.ge.f32.partialorder %v3336_v56, 0.0  ;;  %v2017_v14 = vpack.c.bf16 %v965_v62, %v964_v51  ;;  %v2019_v53 = vpack.c.bf16 %v983_v42, %v982_v59  ;;  %vm630_vm10 = vcmp.ge.f32.partialorder %v3337_v40, 0.0  ;;  %v997_v61 = vld [vmem:[%s3290_s3 + $0x358] sm:$0xff]  ;;  %v1035_v26 = vld [vmem:[%s3290_s3 + $0x488] sm:$0xff]  ;;  %v998_v12 = vld [vmem:[%s3290_s3 + $0x360] sm:$0xff] }
 0x133   :  { %v850_v32 = vsub.f32 1.0, %v839_v18  ;;  %v722_v3 = vmul.f32 %v2939_v7, %v711_v41  ;;  %v2045_v31 = vpack.c.bf16 %v995_v16, %v994_v63  ;;  %v790_v17 = vmul.f32 %v2902_v43, %v779_v54  ;;  %v999_v50 = vld [vmem:[%s3290_s3 + $0x368] sm:$0xff]  ;;  %v1016_v44 = vld [vmem:[%s3290_s3 + $0x3f0] sm:$0xff]  ;;  %v1017_v30 = vld [vmem:[%s3290_s3 + $0x3f8] sm:$0xff] }
 0x134   :  { %2010 = vmatpush3.bf16.msra.mxu0 %v2009_v25  ;;  %v2143_v2 = vpop.eup %2142  ;;  %v2047_v60 = vpack.c.bf16 %v1013_v5, %v1012_v58  ;;  %v855_v38 = vsub.f32 1.0, %v844_v1  ;;  %v646_v43 = vsel %vm635_vm9, 1.0, %v3329_v33  ;;  %v641_v15 = vsel %vm630_vm10, 1.0, %v3329_v33  ;;  %v968_v25 = vld [vmem:[%s3290_s3 + $0x270] sm:$0xff]  ;;  %v1018_v62 = vld [vmem:[%s3290_s3 + $0x400] sm:$0xff]  ;;  %v1001_v5 = vld [vmem:[%s3290_s3 + $0x378] sm:$0xff] }
 0x135   :  { %2012 = vmatprep.subr.bf16.mxu0 %v2011_v27  ;;  %2038 = vmatpush3.bf16.msra.mxu1 %v2037_v39  ;;  %v841_v37 = vmul.f32 %v2143_v2, %v786_v22  ;;  %v799_v28 = vsub.f32 0.0, %v3338_v23  ;;  %vm632_vm11 = vcmp.ge.f32.partialorder %v3339_v24, 0.0  ;;  %v2021_v49 = vpack.c.bf16 %v967_v13, %v966_v19  ;;  %v969_v27 = vld [vmem:[%s3290_s3 + $0x278] sm:$0xff]  ;;  %v1034_v39 = vld [vmem:[%s3290_s3 + $0x480] sm:$0xff]  ;;  %v1036_v42 = vld [vmem:[%s3290_s3 + $0x490] sm:$0xff] }
 0x136   :  { %2040 = vmatprep.subr.bf16.mxu1 %v2039_v47  ;;  %v861_v45 = vmul.f32 %v850_v32, %v641_v15  ;;  %v733_v46 = vadd.f32 1.4214138, %v722_v3  ;;  %v2023_v8 = vpack.c.bf16 %v985_v4, %v984_v11  ;;  %v2049_v21 = vpack.c.bf16 %v997_v61, %v996_v52  ;;  %v1037_v2 = vld [vmem:[%s3290_s3 + $0x498] sm:$0xff]  ;;  %v1000_v58 = vld [vmem:[%s3290_s3 + $0x370] sm:$0xff]  ;;  %v3342_v56 = vld [vmem:[#allocation2_spill] sm:$0xff] }
 0x137   :  { %v852_v0 = vsub.f32 1.0, %v841_v37  ;;  %v866_v48 = vmul.f32 %v855_v38, %v646_v43  ;;  %v2051_v47 = vpack.c.bf16 %v1015_v10, %v1014_v9  ;;  %v643_v20 = vsel %vm632_vm11, 1.0, %v3329_v33  ;;  %v1021_v11 = vld [vmem:[%s3290_s3 + $0x418] sm:$0xff]  ;;  %v1039_v61 = vld [vmem:[%s3290_s3 + $0x4a8] sm:$0xff]  ;;  %v1050_v38 = vld [vmem:[%s3290_s3 + $0x500] sm:$0xff] }
 0x138   :  { %2014 = vmatpush3.bf16.msra.mxu0 %v2013_v6  ;;  %v2145_v29 = vpop.eup %2144  ;;  %v810_v35 = vmul.f32 %v799_v28, %v3338_v23  ;;  %v3340_v6 = vld [vmem:[#allocation10_spill] sm:$0xff]  ;;  %v2025_v51 = vpack.c.bf16 %v969_v27, %v968_v25  ;;  %v2059_v18 = vpack.c.bf16 %v1035_v26, %v1034_v39  ;;  %v872_v41 = vadd.f32 1.0, %v861_v45  ;;  %v3343_v43 = vld [vmem:[#allocation7_spill] sm:$0xff] }
 0x139   :  { %2016 = vmatprep.subr.bf16.mxu0 %v2015_v55  ;;  %2042 = vmatpush3.bf16.msra.mxu1 %v2041_v57  ;;  %v845_v36 = vmul.f32 %v2145_v29, %v790_v17  ;;  %vm636_vm12 = vcmp.ge.f32.partialorder %v3340_v6, 0.0  ;;  %v744_v55 = vmul.f32 %v2939_v7, %v733_v46  ;;  %v1019_v57 = vld [vmem:[%s3290_s3 + $0x408] sm:$0xff]  ;;  %v2053_v59 = vpack.c.bf16 %v999_v50, %v998_v12  ;;  %v1038_v17 = vld [vmem:[%s3290_s3 + $0x4a0] sm:$0xff]  ;;  %v1040_v46 = vld [vmem:[%s3290_s3 + $0x4b0] sm:$0xff] }
 0x13a   :  { %2044 = vmatprep.subr.bf16.mxu1 %v2043_v34  ;;  %v2055_v22 = vpack.c.bf16 %v1017_v30, %v1016_v44  ;;  %v863_v54 = vmul.f32 %v852_v0, %v643_v20  ;;  %v3341_v34 = vld [vmem:[#allocation5_spill] sm:$0xff]  ;;  %v877_v1 = vadd.f32 1.0, %v866_v48  ;;  %v829_v40 = vmul.f32 1.442695, %v810_v35  ;;  %v1051_v29 = vld [vmem:[%s3290_s3 + $0x508] sm:$0xff]  ;;  %v1022_v28 = vld [vmem:[%s3290_s3 + $0x420] sm:$0xff] }
 0x13b   :  { %v613_v63 = vmul.f32 0.5, %v3341_v34  ;;  %v856_v16 = vsub.f32 1.0, %v845_v36  ;;  %v2061_v32 = vpack.c.bf16 %v1019_v57, %v1018_v62  ;;  %v755_v19 = vadd.f32 -0.28449672, %v744_v55  ;;  %v1023_v24 = vld [vmem:[%s3290_s3 + $0x428] sm:$0xff]  ;;  %v1024_v36 = vld [vmem:[%s3290_s3 + $0x430] sm:$0xff] }
 0x13c   :  { %2018 = vmatpush3.bf16.msra.mxu0 %v2017_v14  ;;  %v608_v14 = vmul.f32 0.5, %v3342_v56  ;;  %v2063_v13 = vpack.c.bf16 %v1037_v2, %v1036_v42  ;;  %v2057_v37 = vpack.c.bf16 %v1001_v5, %v1000_v58  ;;  %v874_v4 = vadd.f32 1.0, %v863_v54  ;;  %v1025_v48 = vld [vmem:[%s3290_s3 + $0x438] sm:$0xff]  ;;  %v1042_v44 = vld [vmem:[%s3290_s3 + $0x4c0] sm:$0xff]  ;;  %v1043_v30 = vld [vmem:[%s3290_s3 + $0x4c8] sm:$0xff] }
 0x13d   :  { %2020 = vmatprep.subr.bf16.mxu0 %v2019_v53  ;;  %2046 = vmatpush3.bf16.msra.mxu1 %v2045_v31  ;;  %v647_v53 = vsel %vm636_vm12, 1.0, %v3329_v33  ;;  %v1020_v31 = vld [vmem:[%s3290_s3 + $0x410] sm:$0xff]  ;;  %v888_v52 = vmul.f32 %v877_v1, %v613_v63  ;;  %2146 = vpow2.f32 %v829_v40  ;;  %v610_v9 = vmul.f32 0.5, %v3343_v43  ;;  %v1046_v54 = vld [vmem:[%s3290_s3 + $0x4e0] sm:$0xff]  ;;  %v1047_v34 = vld [vmem:[%s3290_s3 + $0x4e8] sm:$0xff] }
 0x13e   :  { %2048 = vmatprep.subr.bf16.mxu1 %v2047_v60  ;;  %v883_v3 = vmul.f32 %v872_v41, %v608_v14  ;;  %v867_v60 = vmul.f32 %v856_v16, %v647_v53  ;;  %v2065_v10 = vpack.c.bf16 %v1021_v11, %v1020_v31  ;;  %v766_v15 = vmul.f32 %v2939_v7, %v755_v19  ;;  %v1044_v55 = vld [vmem:[%s3290_s3 + $0x4d0] sm:$0xff]  ;;  %v3347_v63 = vld [vmem:[#allocation11_spill] sm:$0xff]  ;;  %v1030_v58 = vld [vmem:[%s3290_s3 + $0x460] sm:$0xff] }
 0x13f   :  { %v2067_v23 = vpack.c.bf16 %v1039_v61, %v1038_v17  ;;  %v885_v25 = vmul.f32 %v874_v4, %v610_v9  ;;  %v3344_v45 = vmov 0.0|0.0   ;;  %v2069_v26 = vpack.c.bf16 %v1023_v24, %v1022_v28  ;;  %v1028_v42 = vld [vmem:[%s3290_s3 + $0x450] sm:$0xff]  ;;  %v1031_v5 = vld [vmem:[%s3290_s3 + $0x468] sm:$0xff]  ;;  %v1049_v53 = vld [vmem:[%s3290_s3 + $0x4f8] sm:$0xff] }
 0x140   :  { %2022 = vmatpush3.bf16.msra.mxu0 %v2021_v49  ;;  %v2092_v49 = vpack.c.bf16 %v1051_v29, %v1050_v38  ;;  %v878_v27 = vadd.f32 1.0, %v867_v60  ;;  %v777_v12 = vadd.f32 0.2548296, %v766_v15  ;;  %v3346_v50 = vmov 0.0   ;;  %v1048_v14 = vld [vmem:[%s3290_s3 + $0x4f0] sm:$0xff]  ;;  %v1509_v60 = vld [vmem:[%s3292_s5] sm:$0xff] }
 0x141   :  { %2024 = vmatprep.subr.bf16.mxu0 %v2023_v8  ;;  %2050 = vmatpush3.bf16.msra.mxu1 %v2049_v21  ;;  %v1041_v8 = vld [vmem:[%s3290_s3 + $0x4b8] sm:$0xff]  ;;  %v2073_v20 = vpack.c.bf16 %v1025_v48, %v1024_v36  ;;  %v2075_v6 = vpack.c.bf16 %v1043_v30, %v1042_v44  ;;  %vm634_vm14 = vcmp.ge.f32.partialorder %v3347_v63, 0.0  ;;  %v2083_v2 = vpack.c.bf16 %v1047_v34, %v1046_v54  ;;  %v1032_v19 = vld [vmem:[%s3290_s3 + $0x470] sm:$0xff]  ;;  %v1513_v9 = vld [vmem:[%s3292_s5 + $0x20] sm:$0xf] }
 0x142   :  { %2052 = vmatprep.subr.bf16.mxu1 %v2051_v47  ;;  %v3345_v21 = vld [vmem:[#allocation9_spill] sm:$0xff]  ;;  %v2071_v0 = vpack.c.bf16 %v1041_v8, %v1040_v46  ;;  %v788_v35 = vmul.f32 %v2939_v7, %v777_v12  ;;  %v645_v56 = vsel %vm634_vm14, 1.0, %v3329_v33  ;;  %v2085_v40 = vpack.c.bf16 %v1031_v5, %v1030_v58  ;;  %v3348_v11 = vld [vmem:[#allocation4_spill] sm:$0xff]  ;;  %v1657_v28 = vld [vmem:[%s3293_s4] ss:$0 sm:$0xff] }
 0x143   :  { %v614_v39 = vmul.f32 0.5, %v3345_v21  ;;  %v1045_v7 = vld [vmem:[%s3290_s3 + $0x4d8] sm:$0xff]  ;;  %v1511_v38 = vld [vmem:[%s3292_s5 + $0x10] sm:$0xff] }
 0x144   :  { %2026 = vmatpush3.bf16.msra.mxu0 %v2025_v51  ;;  %v1026_v51 = vld [vmem:[%s3290_s3 + $0x440] sm:$0xff]  ;;  %v1512_v29 = vld [vmem:[%s3292_s5 + $0x18] sm:$0xff] }
 0x145   :  { %2060 = vmatprep.subr.bf16.mxu0 %v2059_v18  ;;  %2054 = vmatpush3.bf16.msra.mxu1 %v2053_v59  ;;  %v889_v47 = vmul.f32 %v878_v27, %v614_v39  ;;  %v1027_v18 = vld [vmem:[%s3290_s3 + $0x448] sm:$0xff]  ;;  %v2079_v59 = vpack.c.bf16 %v1045_v7, %v1044_v55  ;;  %v2098_v43 = vpack.c.bf16 %v1512_v29, %v1511_v38 }
 0x146   :  { %2056 = vmatprep.subr.bf16.mxu1 %v2055_v22  ;;  %v2077_v62 = vpack.c.bf16 %v1027_v18, %v1026_v51  ;;  %v1029_v22 = vld [vmem:[%s3290_s3 + $0x458] sm:$0xff] }
 0x147   :  { %1268 = vmatmul.mubr.f32.vlgmr.msra.gmra.mrb[6].mxu0 %v883_v3  ;;  %v2147_v41 = vpop.eup %2146  ;;  %v2081_v16 = vpack.c.bf16 %v1029_v22, %v1028_v42  ;;  %v2087_v3 = vpack.c.bf16 %v1049_v53, %v1048_v14 }
 0x148   :  { %2062 = vmatpush3.bf16.msra.mxu0 %v2061_v32  ;;  %1407 = vmatprep.mubr.f32.mxu0 %v888_v52  ;;  %v843_v57 = vmul.f32 %v2147_v41, %v788_v35  ;;  %v1510_v52 = vld [vmem:[%s3292_s5 + $0x8] sm:$0xff] }
 0x149   :  { %2064 = vmatprep.subr.bf16.mxu0 %v2063_v13  ;;  %2058 = vmatpush3.bf16.msra.mxu1 %v2057_v37  ;;  %v1033_v13 = vld [vmem:[%s3290_s3 + $0x478] sm:$0xff]  ;;  %v612_v37 = vmul.f32 0.5, %v3348_v11  ;;  %v2095_v61 = vpack.c.bf16 %v1510_v52, %v1509_v60 }
 0x14a   :  { %2091 = vmatprep.subr.bf16.mxu1 %v3344_v45  ;;  %v854_v1 = vsub.f32 1.0, %v843_v57  ;;  %v2089_v31 = vpack.c.bf16 %v1033_v13, %v1032_v19  ;;  %v1659_v19 = vld [vmem:[%s3294_s6] ss:$0 sm:$0xff] }
 0x14c   :  { %2066 = vmatpush3.bf16.msra.mxu0 %v2065_v10  ;;  %1338 = vmatmul.mubr.f32.vlgmr.msra.gmra.mrb[10].mxu1 %v885_v25  ;;  %v865_v32 = vmul.f32 %v854_v1, %v645_v56 }
 0x14d   :  { %2068 = vmatprep.subr.bf16.mxu0 %v2067_v23  ;;  %2093 = vmatpush3.bf16.msra.mxu1 %v2092_v49 }
 0x14e   :  { %1869 = vmatprep.mubr.msk.f32.mxu1 %vm2162_vm2, %v3346_v50  ;;  %2094 = vmatprep.subr.bf16.mxu1 %v3344_v45  ;;  %v876_v17 = vadd.f32 1.0, %v865_v32 }
 0x150   :  { %2070 = vmatpush3.bf16.msra.mxu0 %v2069_v26  ;;  %1870 = vmatmul.mubr.msk.f32.vlgmr.msra.gmra.mrb[12].mxu1 %vm1059_vm13, %v889_v47  ;;  %v887_v4 = vmul.f32 %v876_v17, %v612_v37 }
 0x151   :  { %2072 = vmatprep.subr.bf16.mxu0 %v2071_v0  ;;  %1882 = vmatprep.mubr.msk.f32.mxu1 %vm2162_vm2, %v3346_v50 }
 0x152   :  { %2096 = vmatpush3.bf16.msra.mxu1 %v2095_v61 }
 0x153   :  { %2097 = vmatprep.subr.bf16.mxu1 %v3344_v45 }
 0x154   :  { %2074 = vmatpush3.bf16.msra.mxu0 %v2073_v20 }
 0x155   :  { %2076 = vmatprep.subr.bf16.mxu0 %v2075_v6 }
 0x156   :  { %2099 = vmatpush3.bf16.msra.mxu1 %v2098_v43 }
 0x157   :  { %1880 = vmatprep.subr.mxu1 %v3346_v50 }
 0x158   :  { %2078 = vmatpush3.bf16.msra.mxu0 %v2077_v62 }
 0x159   :  { %2080 = vmatprep.subr.bf16.mxu0 %v2079_v59 }
 0x15a   :  { %1881 = vmatpush3.msk.msra.mxu1 %vm145_vm0, %v1513_v9 }
 0x15c   :  { %2082 = vmatpush3.bf16.msra.mxu0 %v2081_v16 }
 0x15d   :  { %2084 = vmatprep.subr.bf16.mxu0 %v2083_v2 }
 0x160   :  { %2086 = vmatpush3.bf16.msra.mxu0 %v2085_v40 }
 0x161   :  { %2088 = vmatprep.subr.bf16.mxu0 %v2087_v3 }
 0x164   :  { %2090 = vmatpush3.bf16.msra.mxu0 %v2089_v31 }
 0x167   :  { %1408 = vmatmul.mubr.f32.vlgmr.msra.gmra.mrb[8].mxu0 %v887_v4 }
 0x1f9   :  { %v1700_v10 = vpop.f32.mrb[4].mxu0 }
 0x1fa   :  { %v1701_v15 = vpop.f32.mrb[5].mxu0 }
 0x1fb   :  { %v1702_v23 = vadd.f32 %v1701_v15, %v1700_v10 }
 0x1fd   :  { %v1130_v25 = vadd.f32 %v1702_v23, %v1657_v28 }
 0x1fe   :  { %v1735_v24 = vpop.f32.mrb[8].mxu1 }
 0x1ff   :  { %v1736_v49 = vpop.f32.mrb[9].mxu1 }
 0x200   :  { %v1737_v27 = vadd.f32 %v1736_v49, %v1735_v24 }
 0x202   :  { %v1200_v45 = vadd.f32 %v1737_v27, %v1130_v25 }
 0x21a   :  { %v1770_v46 = vpop.f32.mrb[6].mxu0 }
 0x21b   :  { %v1771_v8 = vpop.f32.mrb[7].mxu0 }
 0x21c   :  { %v1772_v21 = vadd.f32 %v1771_v8, %v1770_v46 }
 0x21e   :  { %v1270_v39 = vadd.f32 %v1772_v21, %v1200_v45 }
 0x21f   :  { %v1805_v26 = vpop.f32.mrb[10].mxu1 }
 0x220   :  { %v1806_v12 = vpop.f32.mrb[11].mxu1 }
 0x221   :  { %v1807_v0 = vadd.f32 %v1806_v12, %v1805_v26 }
 0x223   :  { %v1340_v36 = vadd.f32 %v1807_v0, %v1270_v39  ;;  %v1479_v48 = vpop.f32.mrb[12].mxu1 }
 0x224   :  { %v1871_v47 = vpop.f32.mrb[13].mxu1 }
 0x23a   :  { %v1840_v50 = vpop.f32.mrb[8].mxu0 }
 0x23b   :  { %v1841_v44 = vpop.f32.mrb[9].mxu0 }
 0x23c   :  { %v1842_v30 = vadd.f32 %v1841_v44, %v1840_v50 }
 0x23e   :  { %v1410_v20 = vadd.f32 %v1842_v30, %v1340_v36 }
 0x240   :  { %v1480_v35 = vadd.f32 %v1479_v48, %v1410_v20 }
 0x242   :  { %v1484_v6 = vmul.f32 0.70710677, %v1480_v35  ;;  %v1483_v40 = vmul.f32 0.5, %v1480_v35 }
 0x244   :  { %v1487_v51 = vand.u32 2147483647, %v1484_v6  ;;  %vm1485_vm15 = vcmp.ge.f32.partialorder %v1484_v6, 0.0 }
 0x245   :  { %v1486_v14 = vsel %vm1485_vm15, 1.0, %v3329_v33 }
 0x246   :  { %v1488_v18 = vmul.f32 0.3275911, %v1487_v51  ;;  %v1500_v55 = vsub.f32 0.0, %v1487_v51 }
 0x248   :  { %v1489_v41 = vadd.f32 1.0, %v1488_v18  ;;  %v1501_v62 = vmul.f32 %v1500_v55, %v1487_v51 }
 0x24a   :  { %2148 = vrcp.f32 %v1489_v41  ;;  %v1502_v42 = vmul.f32 1.442695, %v1501_v62 }
 0x24c   :  { %2150 = vpow2.f32 %v1502_v42 }
 0x254   :  { %v2149_v7 = vpop.eup %2148 }
 0x255   :  { %v1491_v57 = vmul.f32 1.0614054, %v2149_v7 }
 0x256   :  { %v2151_v58 = vpop.eup %2150 }
 0x257   :  { %v1492_v59 = vadd.f32 -1.4531521, %v1491_v57 }
 0x259   :  { %v1493_v22 = vmul.f32 %v2149_v7, %v1492_v59 }
 0x25b   :  { %v1494_v54 = vadd.f32 1.4214138, %v1493_v22 }
 0x25d   :  { %v1495_v34 = vmul.f32 %v2149_v7, %v1494_v54 }
 0x25f   :  { %v1496_v63 = vadd.f32 -0.28449672, %v1495_v34 }
 0x261   :  { %v1497_v16 = vmul.f32 %v2149_v7, %v1496_v63 }
 0x263   :  { %v1498_v1 = vadd.f32 0.2548296, %v1497_v16 }
 0x265   :  { %v1499_v2 = vmul.f32 %v2149_v7, %v1498_v1 }
 0x267   :  { %v1504_v5 = vmul.f32 %v2151_v58, %v1499_v2 }
 0x269   :  { %v1505_v56 = vsub.f32 1.0, %v1504_v5 }
 0x26b   :  { %v1506_v53 = vmul.f32 %v1505_v56, %v1486_v14 }
 0x26d   :  { %v1507_v32 = vadd.f32 1.0, %v1506_v53 }
 0x26f   :  { %v1508_v3 = vmul.f32 %v1507_v32, %v1483_v40 }
 0x271   :  { %1883 = vmatmul.mubr.msk.f32.vlgmr.msra.gmra.mrb[14].mxu1 %vm141_vm1, %v1508_v3  ;;  %vm1623_vm1 = vcmask 15360  }
 0x344   :  { %v1593_v13 = vpop.f32.mrb[14].mxu1 }
 0x345   :  { %v1594_v31 = vadd.f32 %v1659_v19, %v1593_v13  ;;  %v1884_v11 = vpop.f32.mrb[15].mxu1 }
 0x347   :  { %v1598_v37 = vmul.f32 0.70710677, %v1594_v31  ;;  %v1597_v39 = vmul.f32 0.5, %v1594_v31 }
 0x349   :  { %v1601_v17 = vand.u32 2147483647, %v1598_v37  ;;  %vm1599_vm0 = vcmp.ge.f32.partialorder %v1598_v37, 0.0 }
 0x34a   :  { %v1600_v8 = vsel %vm1599_vm0, 1.0, %v3329_v33 }
 0x34b   :  { %v1602_v4 = vmul.f32 0.3275911, %v1601_v17  ;;  %v1614_v52 = vsub.f32 0.0, %v1601_v17 }
 0x34d   :  { %v1603_v60 = vadd.f32 1.0, %v1602_v4  ;;  %v1615_v38 = vmul.f32 %v1614_v52, %v1601_v17 }
 0x34f   :  { %2152 = vrcp.f32 %v1603_v60  ;;  %v1616_v9 = vmul.f32 1.442695, %v1615_v38 }
 0x351   :  { %2154 = vpow2.f32 %v1616_v9 }
 0x359   :  { %v2153_v61 = vpop.eup %2152 }
 0x35a   :  { %v1605_v29 = vmul.f32 1.0614054, %v2153_v61 }
 0x35b   :  { %v2155_v27 = vpop.eup %2154 }
 0x35c   :  { %v1606_v43 = vadd.f32 -1.4531521, %v1605_v29 }
 0x35e   :  { %v1607_v10 = vmul.f32 %v2153_v61, %v1606_v43 }
 0x360   :  { %v1608_v15 = vadd.f32 1.4214138, %v1607_v10 }
 0x362   :  { %v1609_v23 = vmul.f32 %v2153_v61, %v1608_v15 }
 0x364   :  { %v1610_v28 = vadd.f32 -0.28449672, %v1609_v23 }
 0x366   :  { %v1611_v24 = vmul.f32 %v2153_v61, %v1610_v28 }
 0x368   :  { %v1612_v49 = vadd.f32 0.2548296, %v1611_v24 }
 0x36a   :  { %v1613_v25 = vmul.f32 %v2153_v61, %v1612_v49 }
 0x36c   :  { %v1618_v45 = vmul.f32 %v2155_v27, %v1613_v25 }
 0x36e   :  { %v1619_v46 = vsub.f32 1.0, %v1618_v45 }
 0x370   :  { %v1620_v21 = vmul.f32 %v1619_v46, %v1600_v8 }
 0x372   :  { %v1621_v26 = vadd.f32 1.0, %v1620_v21 }
 0x374   :  { %v1622_v12 = vmul.f32 %v1621_v26, %v1597_v39 }
 0x376   :  { %v1624_v0 = vsel %vm1623_vm1, %v1622_v12, -inf }
 0x377   :  { %1625 = vmax.xlane.f32.xlu0 %v1624_v0 }
 0x404   :  { %v1626_v36 = vpop.xlane.xlu0 %1625 }
 0x405   :  { %v1627_v48 = vsub.f32 %v1622_v12, %v1626_v36 }
 0x407   :  { %v1628_v47 = vmul.f32 1.442695, %v1627_v48 }
 0x409   :  { %2156 = vpow2.f32 %v1628_v47 }
 0x413   :  { %v2157_v50 = vpop.eup %2156 }
 0x414   :  { %v1630_v44 = vsel %vm1623_vm1, %v2157_v50, 0.0 }
 0x415   :  { %1631 = vadd.xlane.f32.xlu0 %v1630_v44 }
 0x4a2   :  { %v1632_v30 = vpop.xlane.xlu0 %1631 }
 0x4a3   :  { %2158 = vrcp.f32 %v1632_v30 }
 0x4ad   :  { %v2159_v20 = vpop.eup %2158 }
 0x4ae   :  { %v1634_v33 = vmul.f32 %v2159_v20, %v2157_v50 }
 0x4b0   :  { %1635 = vst.msk [vmem:[%s3295_s7] sm:$0xff] %vm1623_vm1, %v1634_v33 }

</bundles_post_ra>
